<compile_context>
chip_gen: v7x
topology: tpu7x:2x2x1
jax: 0.10.0
libtpu: 0.0.40
codegen_flags: <defaults>
</compile_context>

<pallas_src>
import functools

import jax
import jax.numpy as jnp
import numpy as np
from jax import lax
from jax.experimental import pallas as pl
from jax.experimental.pallas import tpu as pltpu


def _round_up(x, m):
    return (x + m - 1) // m * m


# ----------------------------------------------------------------------------
# Pallas kernel: one BiLSTM layer, both directions fused per grid step.
#   grid = (n_time_chunks,)   -- sequential ("arbitrary"), state in scratch
# ----------------------------------------------------------------------------
def _make_layer_kernel(chunk, H, io_dtype, unroll):
    def kernel(gx_f_ref, gx_b_ref, whh_ref, out_f_ref, out_b_ref, h_sc, c_sc):
        # gx_f_ref : (chunk, B, 4H)  precomputed gate inputs, fwd time chunk c
        # gx_b_ref : (chunk, B, 4H)  precomputed gate inputs, bwd time chunk
        #                            n_chunks-1-c (walked reversed in-chunk)
        # whh_ref  : (2, H, 4H)      resident recurrent weights (W_hh^T)
        # out_f/b  : (chunk, B, H)   hidden-state outputs for this chunk
        # h_sc,c_sc: (2, B, H) fp32  per-direction recurrent state
        c = pl.program_id(0)

        @pl.when(c == 0)
        def _():
            h_sc[...] = jnp.zeros_like(h_sc)
            c_sc[...] = jnp.zeros_like(c_sc)

        # Static per-direction indices, hoisted out of the serial time loop.
        whh_f = whh_ref[0]          # (H, 4H)
        whh_b = whh_ref[1]

        def cell(gx_row, h_prev, c_prev, whh):
            # MXU matmul in io_dtype (bf16), f32 accumulation; gate math fp32.
            gates = gx_row.astype(jnp.float32) + jnp.dot(
                h_prev.astype(io_dtype), whh,
                preferred_element_type=jnp.float32)              # (B, 4H)
            # PyTorch gate order: i, f, g, o
            i_g = jax.nn.sigmoid(gates[:, 0 * H:1 * H])
            f_g = jax.nn.sigmoid(gates[:, 1 * H:2 * H])
            g_g = jnp.tanh(gates[:, 2 * H:3 * H])
            o_g = jax.nn.sigmoid(gates[:, 3 * H:4 * H])
            c_new = f_g * c_prev + i_g * g_g
            h_new = o_g * jnp.tanh(c_new)
            return h_new, c_new

        def step(j, carry):
            h_f, c_f, h_b, c_b = carry
            jr = chunk - 1 - j                 # backward walks chunk reversed
            # Two independent recurrence chains back-to-back: hides MXU/EUP
            # latency on the serial dependency path (single-TC chips).
            h_f, c_f = cell(gx_f_ref[j], h_f, c_f, whh_f)
            h_b, c_b = cell(gx_b_ref[jr], h_b, c_b, whh_b)
            out_f_ref[j] = h_f.astype(io_dtype)
            out_b_ref[jr] = h_b.astype(io_dtype)
            return h_f, c_f, h_b, c_b

        carry = (h_sc[0], c_sc[0], h_sc[1], c_sc[1])
        if unroll is True:
            # Small B*H: fully static in-chunk indices (static loads/stores).
            for j in range(chunk):
                carry = step(j, carry)
        else:
            # Production sizes: partial unroll, sweep {2, 4, 8}.
            carry = lax.fori_loop(0, chunk, step, carry, unroll=unroll)

        h_sc[0] = carry[0]
        c_sc[0] = carry[1]
        h_sc[1] = carry[2]
        c_sc[1] = carry[3]

    return kernel


def _bilstm_layer(gx, whh, T_pad, chunk, io_dtype):
    """Run both directions of one BiLSTM layer.

    gx  : (2, T_pad, B_pad, 4H)  precomputed input-gate projections (io_dtype)
    whh : (2, H, 4H)             W_hh^T per direction (io_dtype)
    returns (out_fwd, out_bwd), each (T_pad, B_pad, H) in io_dtype,
    time in original order.
    """
    _, _, B_pad, G4 = gx.shape
    H = G4 // 4
    n_chunks = T_pad // chunk
    kernel = _make_layer_kernel(chunk, H, io_dtype, unroll=True)

    out_sds = jax.ShapeDtypeStruct((T_pad, B_pad, H), io_dtype)
    return pl.pallas_call(
        kernel,
        out_shape=(out_sds, out_sds),
        grid=(n_chunks,),
        in_specs=[
            # forward gate inputs: direction 0, time chunk c
            pl.BlockSpec((None, chunk, B_pad, 4 * H),
                         lambda c: (0, c, 0, 0)),
            # backward gate inputs: direction 1, time chunk n_chunks-1-c
            pl.BlockSpec((None, chunk, B_pad, 4 * H),
                         lambda c: (1, n_chunks - 1 - c, 0, 0)),
            # recurrent weights: constant index_map -> DMA'd once, resident
            pl.BlockSpec((2, H, 4 * H), lambda c: (0, 0, 0)),
        ],
        out_specs=(
            pl.BlockSpec((chunk, B_pad, H), lambda c: (c, 0, 0)),
            pl.BlockSpec((chunk, B_pad, H), lambda c: (n_chunks - 1 - c, 0, 0)),
        ),
        scratch_shapes=[
            pltpu.VMEM((2, B_pad, H), jnp.float32),   # h state (fwd, bwd)
            pltpu.VMEM((2, B_pad, H), jnp.float32),   # c state (fwd, bwd)
        ],
        compiler_params=pltpu.CompilerParams(
            dimension_semantics=("arbitrary",),       # serial recurrence
        ),
    )(gx, gx, whh)


# ----------------------------------------------------------------------------
# BiLSTM module (multi-layer, bidirectional)
# ----------------------------------------------------------------------------
def init_bilstm_params(key, input_size, hidden_size, num_layers):
    """Deterministic synthetic parameters, PyTorch nn.LSTM shapes."""
    params = []
    for layer in range(num_layers):
        d_in = input_size if layer == 0 else 2 * hidden_size
        layer_params = []
        for _direction in range(2):
            key, k1, k2, k3, k4 = jax.random.split(key, 5)
            scale = 1.0 / np.sqrt(hidden_size)
            w_ih = scale * jax.random.normal(k1, (4 * hidden_size, d_in), jnp.float32)
            w_hh = scale * jax.random.normal(k2, (4 * hidden_size, hidden_size), jnp.float32)
            b_ih = scale * jax.random.normal(k3, (4 * hidden_size,), jnp.float32)
            b_hh = scale * jax.random.normal(k4, (4 * hidden_size,), jnp.float32)
            layer_params.append((w_ih, w_hh, b_ih, b_hh))
        params.append(tuple(layer_params))
    return params


def _bilstm_forward_impl(x, params, io_dtype):
    """x: (B, T, input_size) batch-first; returns (B, T, 2*hidden) fp32."""
    B, T, _ = x.shape
    H = params[0][0][1].shape[1]              # w_hh: (4H, H)

    chunk = min(32, T)                        # time steps per grid iteration
    T_pad = _round_up(T, chunk)
    b_mult = 16 if io_dtype == jnp.bfloat16 else 8   # sublane packing
    B_pad = _round_up(B, b_mult)

    # time-major once; downstream everything is (T, B, feat)
    x_tm = jnp.transpose(x, (1, 0, 2)).astype(jnp.float32)      # (T, B, D)
    sources = [x_tm]          # per-layer list of source feature streams

    for (fwd, bwd) in params:
        w_ih_f, w_hh_f, b_ih_f, b_hh_f = fwd
        w_ih_b, w_hh_b, b_ih_b, b_hh_b = bwd
        wih = jnp.stack([w_ih_f, w_ih_b])                        # (2, 4H, D_in)
        bias = jnp.stack([b_ih_f + b_hh_f, b_ih_b + b_hh_b])     # (2, 4H)

        # Hoisted input projection: one 2-D MXU GEMM per source stream
        # (bf16 operands, f32 accumulation); no (T, B, 2H) concat is built.
        acc = None
        off = 0
        for src in sources:
            F = src.shape[-1]
            w = wih[:, :, off:off + F]                           # (2, 4H, F)
            g = jnp.einsum('tbf,egf->etbg',
                           src.astype(io_dtype), w.astype(io_dtype),
                           preferred_element_type=jnp.float32)   # (2,T,B,4H)
            acc = g if acc is None else acc + g
            off += F
        gx = (acc + bias[:, None, None, :]).astype(io_dtype)     # (2,T,B,4H)

        # Zero-pad time & batch AFTER the projection: padded gate inputs of
        # exactly 0 keep (h, c) = (0, 0) an exact fixed point of the cell,
        # so no in-kernel mask is needed and no GEMM FLOPs are wasted.
        gx = jnp.pad(gx, ((0, 0), (0, T_pad - T), (0, B_pad - B), (0, 0)))

        whh = jnp.stack([w_hh_f.T, w_hh_b.T]).astype(io_dtype)   # (2, H, 4H)

        out_f, out_b = _bilstm_layer(gx, whh, T_pad, chunk, io_dtype)
        sources = [out_f[:T, :B], out_b[:T, :B]]

    # single final merge into the PyTorch (B, T, 2H) layout
    out = jnp.concatenate(sources, axis=-1)                      # (T, B, 2H)
    return jnp.transpose(out, (1, 0, 2)).astype(jnp.float32)     # (B, T, 2H)


# default (production) path: bf16 activation / weight streams
bilstm_forward = jax.jit(functools.partial(_bilstm_forward_impl,
                                           io_dtype=jnp.bfloat16))
# fp32 I/O path: used for the tight correctness check of the recurrence math
bilstm_forward_f32 = jax.jit(functools.partial(_bilstm_forward_impl,
                                               io_dtype=jnp.float32))


# ----------------------------------------------------------------------------
# Pure-JAX reference (mirrors torch.nn.LSTM math) for self-check.
# ----------------------------------------------------------------------------
def _ref_direction(x_tm, w_ih, w_hh, b_ih, b_hh):
    T, B, _ = x_tm.shape
    H = w_hh.shape[1]

    def step(carry, x_t):
        h, c = carry
        gates = x_t @ w_ih.T + b_ih + h @ w_hh.T + b_hh
        i_g, f_g, g_g, o_g = jnp.split(gates, 4, axis=-1)
        i_g = jax.nn.sigmoid(i_g)
        f_g = jax.nn.sigmoid(f_g)
        g_g = jnp.tanh(g_g)
        o_g = jax.nn.sigmoid(o_g)
        c_new = f_g * c + i_g * g_g
        h_new = o_g * jnp.tanh(c_new)
        return (h_new, c_new), h_new

    init = (jnp.zeros((B, H), jnp.float32), jnp.zeros((B, H), jnp.float32))
    _, out = jax.lax.scan(step, init, x_tm)
    return out


def bilstm_reference(x, params):
    h = jnp.transpose(x, (1, 0, 2)).astype(jnp.float32)
    for (fwd, bwd) in params:
        out_f = _ref_direction(h, *fwd)
        out_b = _ref_direction(h[::-1], *bwd)[::-1]
        h = jnp.concatenate([out_f, out_b], axis=-1)
    return jnp.transpose(h, (1, 0, 2))


# ----------------------------------------------------------------------------
if __name__ == "__main__":
    key = jax.random.PRNGKey(0)

    batch, seq = 2, 8
    input_size, hidden_size, num_layers = 16, 32, 2

    key, kx, kp = jax.random.split(key, 3)
    x = jax.random.normal(kx, (batch, seq, input_size), jnp.float32)
    params = init_bilstm_params(kp, input_size, hidden_size, num_layers)

    ref = jax.block_until_ready(bilstm_reference(x, params))

    # 1) fp32 I/O path: tight check of the Pallas recurrence math.
    out_f32 = jax.block_until_ready(bilstm_forward_f32(x, params))
    assert out_f32.shape == (batch, seq, 2 * hidden_size), out_f32.shape
    if not np.allclose(np.asarray(out_f32), np.asarray(ref), atol=1e-3, rtol=1e-3):
        err = float(np.max(np.abs(np.asarray(out_f32) - np.asarray(ref))))
        raise AssertionError(f"fp32 Pallas BiLSTM mismatch vs reference (max err {err})")

    # 2) bf16 I/O path (default): loose tolerance for bf16 activation/weight
    #    streams; state and gate nonlinearities are still fp32 in-kernel.
    out = jax.block_until_ready(bilstm_forward(x, params))
    assert out.shape == (batch, seq, 2 * hidden_size), out.shape
    if not np.allclose(np.asarray(out), np.asarray(ref), atol=1e-1, rtol=5e-2):
        err = float(np.max(np.abs(np.asarray(out) - np.asarray(ref))))
        raise AssertionError(f"bf16 Pallas BiLSTM mismatch vs reference (max err {err})")

    print("KERNEL_OK")
</pallas_src>

<mosaic_0001>
module attributes {stable_mosaic.version = 11 : i64} {
  func.func @kernel(%arg0: i32, %arg1: memref<1x8x8x128xf32, #tpu.memory_space<vmem>>, %arg2: memref<1x8x8x128xf32, #tpu.memory_space<vmem>>, %arg3: memref<2x32x128xf32, #tpu.memory_space<vmem>>, %arg4: memref<8x8x32xf32, #tpu.memory_space<vmem>>, %arg5: memref<8x8x32xf32, #tpu.memory_space<vmem>>, %arg6: memref<2x8x32xf32, #tpu.memory_space<vmem>>, %arg7: memref<2x8x32xf32, #tpu.memory_space<vmem>>) attributes {dimension_semantics = [#tpu.dimension_semantics<arbitrary>], iteration_bounds = array<i64: 1>, scalar_prefetch = 0 : i64, scratch_operands = 2 : i64, tpu.core_type = #tpu.core_type<tc>, window_params = [{transform_indices = @transform_0, window_bounds = array<i64: 1, 8, 8, 128>}, {transform_indices = @transform_1, window_bounds = array<i64: 1, 8, 8, 128>}, {pipeline_mode = #tpu.pipeline_mode<synchronous>, transform_indices = @transform_2, window_bounds = array<i64: 2, 32, 128>}, {transform_indices = @transform_3, window_bounds = array<i64: 8, 8, 32>}, {transform_indices = @transform_4, window_bounds = array<i64: 8, 8, 32>}]} {
    %c0_i32 = arith.constant 0 : i32
    %0 = arith.cmpi eq, %arg0, %c0_i32 : i32
    %1 = arith.extui %0 : i1 to i32
    %c0_i32_0 = arith.constant 0 : i32
    %2 = arith.cmpi ne, %1, %c0_i32_0 : i32
    scf.if %2 {
      %cst_198 = arith.constant 0.000000e+00 : f32
      %539 = vector.broadcast %cst_198 : f32 to vector<2x8x32xf32>
      %c0_199 = arith.constant 0 : index
      %c0_200 = arith.constant 0 : index
      %c0_201 = arith.constant 0 : index
      %540 = vector.load %arg6[%c0_199, %c0_200, %c0_201] : memref<2x8x32xf32, #tpu.memory_space<vmem>>, vector<2x8x32xf32>
      tpu.vector_store %arg6[%c0_199, %c0_200, %c0_201], %539 {strides = array<i32>} : memref<2x8x32xf32, #tpu.memory_space<vmem>>, vector<2x8x32xf32>,
      %cst_202 = arith.constant 0.000000e+00 : f32
      %541 = vector.broadcast %cst_202 : f32 to vector<2x8x32xf32>
      %c0_203 = arith.constant 0 : index
      %c0_204 = arith.constant 0 : index
      %c0_205 = arith.constant 0 : index
      %542 = vector.load %arg7[%c0_203, %c0_204, %c0_205] : memref<2x8x32xf32, #tpu.memory_space<vmem>>, vector<2x8x32xf32>
      tpu.vector_store %arg7[%c0_203, %c0_204, %c0_205], %541 {strides = array<i32>} : memref<2x8x32xf32, #tpu.memory_space<vmem>>, vector<2x8x32xf32>,
    } else {
    }
    %c0 = arith.constant 0 : index
    %c0_1 = arith.constant 0 : index
    %c0_2 = arith.constant 0 : index
    %3 = vector.load %arg3[%c0, %c0_1, %c0_2] : memref<2x32x128xf32, #tpu.memory_space<vmem>>, vector<1x32x128xf32>
    %4 = vector.shape_cast %3 : vector<1x32x128xf32> to vector<32x128xf32>
    %c1 = arith.constant 1 : index
    %c0_3 = arith.constant 0 : index
    %c0_4 = arith.constant 0 : index
    %5 = vector.load %arg3[%c1, %c0_3, %c0_4] : memref<2x32x128xf32, #tpu.memory_space<vmem>>, vector<1x32x128xf32>
    %6 = vector.shape_cast %5 : vector<1x32x128xf32> to vector<32x128xf32>
    %c0_5 = arith.constant 0 : index
    %c0_6 = arith.constant 0 : index
    %c0_7 = arith.constant 0 : index
    %7 = vector.load %arg6[%c0_5, %c0_6, %c0_7] : memref<2x8x32xf32, #tpu.memory_space<vmem>>, vector<1x8x32xf32>
    %8 = vector.shape_cast %7 : vector<1x8x32xf32> to vector<8x32xf32>
    %c0_8 = arith.constant 0 : index
    %c0_9 = arith.constant 0 : index
    %c0_10 = arith.constant 0 : index
    %9 = vector.load %arg7[%c0_8, %c0_9, %c0_10] : memref<2x8x32xf32, #tpu.memory_space<vmem>>, vector<1x8x32xf32>
    %10 = vector.shape_cast %9 : vector<1x8x32xf32> to vector<8x32xf32>
    %c1_11 = arith.constant 1 : index
    %c0_12 = arith.constant 0 : index
    %c0_13 = arith.constant 0 : index
    %11 = vector.load %arg6[%c1_11, %c0_12, %c0_13] : memref<2x8x32xf32, #tpu.memory_space<vmem>>, vector<1x8x32xf32>
    %12 = vector.shape_cast %11 : vector<1x8x32xf32> to vector<8x32xf32>
    %c1_14 = arith.constant 1 : index
    %c0_15 = arith.constant 0 : index
    %c0_16 = arith.constant 0 : index
    %13 = vector.load %arg7[%c1_14, %c0_15, %c0_16] : memref<2x8x32xf32, #tpu.memory_space<vmem>>, vector<1x8x32xf32>
    %14 = vector.shape_cast %13 : vector<1x8x32xf32> to vector<8x32xf32>
    %c0_17 = arith.constant 0 : index
    %c0_18 = arith.constant 0 : index
    %c0_19 = arith.constant 0 : index
    %c0_20 = arith.constant 0 : index
    %15 = vector.load %arg1[%c0_17, %c0_18, %c0_19, %c0_20] : memref<1x8x8x128xf32, #tpu.memory_space<vmem>>, vector<1x1x8x128xf32>
    %16 = vector.shape_cast %15 : vector<1x1x8x128xf32> to vector<8x128xf32>
    %cst = arith.constant dense<0.000000e+00> : vector<8x128xf32>
    %17 = tpu.matmul %8, %4, %cst {dimension_numbers = #tpu.dot_dimension_numbers<[1], [0], [0], [1], [0, 0, 1, 1], [], []>} : vector<8x32xf32>, vector<32x128xf32>, vector<8x128xf32> -> vector<8x128xf32>
    %18 = arith.addf %16, %17 : vector<8x128xf32>
    %19 = vector.extract_strided_slice %18 {offsets = [0, 0], sizes = [8, 32], strides = [1, 1]} : vector<8x128xf32> to vector<8x32xf32>
    %20 = arith.negf %19 : vector<8x32xf32>
    %21 = math.exp %20 : vector<8x32xf32>
    %cst_21 = arith.constant 1.000000e+00 : f32
    %22 = vector.broadcast %cst_21 : f32 to vector<8x32xf32>
    %23 = arith.addf %22, %21 : vector<8x32xf32>
    %24 = arith.divf %22, %23 : vector<8x32xf32>
    %25 = vector.extract_strided_slice %18 {offsets = [0, 32], sizes = [8, 32], strides = [1, 1]} : vector<8x128xf32> to vector<8x32xf32>
    %26 = arith.negf %25 : vector<8x32xf32>
    %27 = math.exp %26 : vector<8x32xf32>
    %cst_22 = arith.constant 1.000000e+00 : f32
    %28 = vector.broadcast %cst_22 : f32 to vector<8x32xf32>
    %29 = arith.addf %28, %27 : vector<8x32xf32>
    %30 = arith.divf %28, %29 : vector<8x32xf32>
    %31 = vector.extract_strided_slice %18 {offsets = [0, 64], sizes = [8, 32], strides = [1, 1]} : vector<8x128xf32> to vector<8x32xf32>
    %32 = math.tanh %31 : vector<8x32xf32>
    %33 = vector.extract_strided_slice %18 {offsets = [0, 96], sizes = [8, 32], strides = [1, 1]} : vector<8x128xf32> to vector<8x32xf32>
    %34 = arith.negf %33 : vector<8x32xf32>
    %35 = math.exp %34 : vector<8x32xf32>
    %cst_23 = arith.constant 1.000000e+00 : f32
    %36 = vector.broadcast %cst_23 : f32 to vector<8x32xf32>
    %37 = arith.addf %36, %35 : vector<8x32xf32>
    %38 = arith.divf %36, %37 : vector<8x32xf32>
    %39 = arith.mulf %30, %10 : vector<8x32xf32>
    %40 = arith.mulf %24, %32 : vector<8x32xf32>
    %41 = arith.addf %39, %40 : vector<8x32xf32>
    %42 = math.tanh %41 : vector<8x32xf32>
    %43 = arith.mulf %38, %42 : vector<8x32xf32>
    %c0_24 = arith.constant 0 : index
    %c7 = arith.constant 7 : index
    %c0_25 = arith.constant 0 : index
    %c0_26 = arith.constant 0 : index
    %44 = vector.load %arg2[%c0_24, %c7, %c0_25, %c0_26] : memref<1x8x8x128xf32, #tpu.memory_space<vmem>>, vector<1x1x8x128xf32>
    %45 = vector.shape_cast %44 : vector<1x1x8x128xf32> to vector<8x128xf32>
    %cst_27 = arith.constant dense<0.000000e+00> : vector<8x128xf32>
    %46 = tpu.matmul %12, %6, %cst_27 {dimension_numbers = #tpu.dot_dimension_numbers<[1], [0], [0], [1], [0, 0, 1, 1], [], []>} : vector<8x32xf32>, vector<32x128xf32>, vector<8x128xf32> -> vector<8x128xf32>
    %47 = arith.addf %45, %46 : vector<8x128xf32>
    %48 = vector.extract_strided_slice %47 {offsets = [0, 0], sizes = [8, 32], strides = [1, 1]} : vector<8x128xf32> to vector<8x32xf32>
    %49 = arith.negf %48 : vector<8x32xf32>
    %50 = math.exp %49 : vector<8x32xf32>
    %cst_28 = arith.constant 1.000000e+00 : f32
    %51 = vector.broadcast %cst_28 : f32 to vector<8x32xf32>
    %52 = arith.addf %51, %50 : vector<8x32xf32>
    %53 = arith.divf %51, %52 : vector<8x32xf32>
    %54 = vector.extract_strided_slice %47 {offsets = [0, 32], sizes = [8, 32], strides = [1, 1]} : vector<8x128xf32> to vector<8x32xf32>
    %55 = arith.negf %54 : vector<8x32xf32>
    %56 = math.exp %55 : vector<8x32xf32>
    %cst_29 = arith.constant 1.000000e+00 : f32
    %57 = vector.broadcast %cst_29 : f32 to vector<8x32xf32>
    %58 = arith.addf %57, %56 : vector<8x32xf32>
    %59 = arith.divf %57, %58 : vector<8x32xf32>
    %60 = vector.extract_strided_slice %47 {offsets = [0, 64], sizes = [8, 32], strides = [1, 1]} : vector<8x128xf32> to vector<8x32xf32>
    %61 = math.tanh %60 : vector<8x32xf32>
    %62 = vector.extract_strided_slice %47 {offsets = [0, 96], sizes = [8, 32], strides = [1, 1]} : vector<8x128xf32> to vector<8x32xf32>
    %63 = arith.negf %62 : vector<8x32xf32>
    %64 = math.exp %63 : vector<8x32xf32>
    %cst_30 = arith.constant 1.000000e+00 : f32
    %65 = vector.broadcast %cst_30 : f32 to vector<8x32xf32>
    %66 = arith.addf %65, %64 : vector<8x32xf32>
    %67 = arith.divf %65, %66 : vector<8x32xf32>
    %68 = arith.mulf %59, %14 : vector<8x32xf32>
    %69 = arith.mulf %53, %61 : vector<8x32xf32>
    %70 = arith.addf %68, %69 : vector<8x32xf32>
    %71 = math.tanh %70 : vector<8x32xf32>
    %72 = arith.mulf %67, %71 : vector<8x32xf32>
    %c0_31 = arith.constant 0 : index
    %c0_32 = arith.constant 0 : index
    %c0_33 = arith.constant 0 : index
    %73 = vector.load %arg4[%c0_31, %c0_32, %c0_33] : memref<8x8x32xf32, #tpu.memory_space<vmem>>, vector<1x8x32xf32>
    %74 = vector.shape_cast %73 : vector<1x8x32xf32> to vector<8x32xf32>
    %75 = vector.shape_cast %43 : vector<8x32xf32> to vector<1x8x32xf32>
    tpu.vector_store %arg4[%c0_31, %c0_32, %c0_33], %75 {strides = array<i32>} : memref<8x8x32xf32, #tpu.memory_space<vmem>>, vector<1x8x32xf32>,
    %c7_34 = arith.constant 7 : index
    %c0_35 = arith.constant 0 : index
    %c0_36 = arith.constant 0 : index
    %76 = vector.load %arg5[%c7_34, %c0_35, %c0_36] : memref<8x8x32xf32, #tpu.memory_space<vmem>>, vector<1x8x32xf32>
    %77 = vector.shape_cast %76 : vector<1x8x32xf32> to vector<8x32xf32>
    %78 = vector.shape_cast %72 : vector<8x32xf32> to vector<1x8x32xf32>
    tpu.vector_store %arg5[%c7_34, %c0_35, %c0_36], %78 {strides = array<i32>} : memref<8x8x32xf32, #tpu.memory_space<vmem>>, vector<1x8x32xf32>,
    %c0_37 = arith.constant 0 : index
    %c1_38 = arith.constant 1 : index
    %c0_39 = arith.constant 0 : index
    %c0_40 = arith.constant 0 : index
    %79 = vector.load %arg1[%c0_37, %c1_38, %c0_39, %c0_40] : memref<1x8x8x128xf32, #tpu.memory_space<vmem>>, vector<1x1x8x128xf32>
    %80 = vector.shape_cast %79 : vector<1x1x8x128xf32> to vector<8x128xf32>
    %cst_41 = arith.constant dense<0.000000e+00> : vector<8x128xf32>
    %81 = tpu.matmul %43, %4, %cst_41 {dimension_numbers = #tpu.dot_dimension_numbers<[1], [0], [0], [1], [0, 0, 1, 1], [], []>} : vector<8x32xf32>, vector<32x128xf32>, vector<8x128xf32> -> vector<8x128xf32>
    %82 = arith.addf %80, %81 : vector<8x128xf32>
    %83 = vector.extract_strided_slice %82 {offsets = [0, 0], sizes = [8, 32], strides = [1, 1]} : vector<8x128xf32> to vector<8x32xf32>
    %84 = arith.negf %83 : vector<8x32xf32>
    %85 = math.exp %84 : vector<8x32xf32>
    %cst_42 = arith.constant 1.000000e+00 : f32
    %86 = vector.broadcast %cst_42 : f32 to vector<8x32xf32>
    %87 = arith.addf %86, %85 : vector<8x32xf32>
    %88 = arith.divf %86, %87 : vector<8x32xf32>
    %89 = vector.extract_strided_slice %82 {offsets = [0, 32], sizes = [8, 32], strides = [1, 1]} : vector<8x128xf32> to vector<8x32xf32>
    %90 = arith.negf %89 : vector<8x32xf32>
    %91 = math.exp %90 : vector<8x32xf32>
    %cst_43 = arith.constant 1.000000e+00 : f32
    %92 = vector.broadcast %cst_43 : f32 to vector<8x32xf32>
    %93 = arith.addf %92, %91 : vector<8x32xf32>
    %94 = arith.divf %92, %93 : vector<8x32xf32>
    %95 = vector.extract_strided_slice %82 {offsets = [0, 64], sizes = [8, 32], strides = [1, 1]} : vector<8x128xf32> to vector<8x32xf32>
    %96 = math.tanh %95 : vector<8x32xf32>
    %97 = vector.extract_strided_slice %82 {offsets = [0, 96], sizes = [8, 32], strides = [1, 1]} : vector<8x128xf32> to vector<8x32xf32>
    %98 = arith.negf %97 : vector<8x32xf32>
    %99 = math.exp %98 : vector<8x32xf32>
    %cst_44 = arith.constant 1.000000e+00 : f32
    %100 = vector.broadcast %cst_44 : f32 to vector<8x32xf32>
    %101 = arith.addf %100, %99 : vector<8x32xf32>
    %102 = arith.divf %100, %101 : vector<8x32xf32>
    %103 = arith.mulf %94, %41 : vector<8x32xf32>
    %104 = arith.mulf %88, %96 : vector<8x32xf32>
    %105 = arith.addf %103, %104 : vector<8x32xf32>
    %106 = math.tanh %105 : vector<8x32xf32>
    %107 = arith.mulf %102, %106 : vector<8x32xf32>
    %c0_45 = arith.constant 0 : index
    %c6 = arith.constant 6 : index
    %c0_46 = arith.constant 0 : index
    %c0_47 = arith.constant 0 : index
    %108 = vector.load %arg2[%c0_45, %c6, %c0_46, %c0_47] : memref<1x8x8x128xf32, #tpu.memory_space<vmem>>, vector<1x1x8x128xf32>
    %109 = vector.shape_cast %108 : vector<1x1x8x128xf32> to vector<8x128xf32>
    %cst_48 = arith.constant dense<0.000000e+00> : vector<8x128xf32>
    %110 = tpu.matmul %72, %6, %cst_48 {dimension_numbers = #tpu.dot_dimension_numbers<[1], [0], [0], [1], [0, 0, 1, 1], [], []>} : vector<8x32xf32>, vector<32x128xf32>, vector<8x128xf32> -> vector<8x128xf32>
    %111 = arith.addf %109, %110 : vector<8x128xf32>
    %112 = vector.extract_strided_slice %111 {offsets = [0, 0], sizes = [8, 32], strides = [1, 1]} : vector<8x128xf32> to vector<8x32xf32>
    %113 = arith.negf %112 : vector<8x32xf32>
    %114 = math.exp %113 : vector<8x32xf32>
    %cst_49 = arith.constant 1.000000e+00 : f32
    %115 = vector.broadcast %cst_49 : f32 to vector<8x32xf32>
    %116 = arith.addf %115, %114 : vector<8x32xf32>
    %117 = arith.divf %115, %116 : vector<8x32xf32>
    %118 = vector.extract_strided_slice %111 {offsets = [0, 32], sizes = [8, 32], strides = [1, 1]} : vector<8x128xf32> to vector<8x32xf32>
    %119 = arith.negf %118 : vector<8x32xf32>
    %120 = math.exp %119 : vector<8x32xf32>
    %cst_50 = arith.constant 1.000000e+00 : f32
    %121 = vector.broadcast %cst_50 : f32 to vector<8x32xf32>
    %122 = arith.addf %121, %120 : vector<8x32xf32>
    %123 = arith.divf %121, %122 : vector<8x32xf32>
    %124 = vector.extract_strided_slice %111 {offsets = [0, 64], sizes = [8, 32], strides = [1, 1]} : vector<8x128xf32> to vector<8x32xf32>
    %125 = math.tanh %124 : vector<8x32xf32>
    %126 = vector.extract_strided_slice %111 {offsets = [0, 96], sizes = [8, 32], strides = [1, 1]} : vector<8x128xf32> to vector<8x32xf32>
    %127 = arith.negf %126 : vector<8x32xf32>
    %128 = math.exp %127 : vector<8x32xf32>
    %cst_51 = arith.constant 1.000000e+00 : f32
    %129 = vector.broadcast %cst_51 : f32 to vector<8x32xf32>
    %130 = arith.addf %129, %128 : vector<8x32xf32>
    %131 = arith.divf %129, %130 : vector<8x32xf32>
    %132 = arith.mulf %123, %70 : vector<8x32xf32>
    %133 = arith.mulf %117, %125 : vector<8x32xf32>
    %134 = arith.addf %132, %133 : vector<8x32xf32>
    %135 = math.tanh %134 : vector<8x32xf32>
    %136 = arith.mulf %131, %135 : vector<8x32xf32>
    %c1_52 = arith.constant 1 : index
    %c0_53 = arith.constant 0 : index
    %c0_54 = arith.constant 0 : index
    %137 = vector.load %arg4[%c1_52, %c0_53, %c0_54] : memref<8x8x32xf32, #tpu.memory_space<vmem>>, vector<1x8x32xf32>
    %138 = vector.shape_cast %137 : vector<1x8x32xf32> to vector<8x32xf32>
    %139 = vector.shape_cast %107 : vector<8x32xf32> to vector<1x8x32xf32>
    tpu.vector_store %arg4[%c1_52, %c0_53, %c0_54], %139 {strides = array<i32>} : memref<8x8x32xf32, #tpu.memory_space<vmem>>, vector<1x8x32xf32>,
    %c6_55 = arith.constant 6 : index
    %c0_56 = arith.constant 0 : index
    %c0_57 = arith.constant 0 : index
    %140 = vector.load %arg5[%c6_55, %c0_56, %c0_57] : memref<8x8x32xf32, #tpu.memory_space<vmem>>, vector<1x8x32xf32>
    %141 = vector.shape_cast %140 : vector<1x8x32xf32> to vector<8x32xf32>
    %142 = vector.shape_cast %136 : vector<8x32xf32> to vector<1x8x32xf32>
    tpu.vector_store %arg5[%c6_55, %c0_56, %c0_57], %142 {strides = array<i32>} : memref<8x8x32xf32, #tpu.memory_space<vmem>>, vector<1x8x32xf32>,
    %c0_58 = arith.constant 0 : index
    %c2 = arith.constant 2 : index
    %c0_59 = arith.constant 0 : index
    %c0_60 = arith.constant 0 : index
    %143 = vector.load %arg1[%c0_58, %c2, %c0_59, %c0_60] : memref<1x8x8x128xf32, #tpu.memory_space<vmem>>, vector<1x1x8x128xf32>
    %144 = vector.shape_cast %143 : vector<1x1x8x128xf32> to vector<8x128xf32>
    %cst_61 = arith.constant dense<0.000000e+00> : vector<8x128xf32>
    %145 = tpu.matmul %107, %4, %cst_61 {dimension_numbers = #tpu.dot_dimension_numbers<[1], [0], [0], [1], [0, 0, 1, 1], [], []>} : vector<8x32xf32>, vector<32x128xf32>, vector<8x128xf32> -> vector<8x128xf32>
    %146 = arith.addf %144, %145 : vector<8x128xf32>
    %147 = vector.extract_strided_slice %146 {offsets = [0, 0], sizes = [8, 32], strides = [1, 1]} : vector<8x128xf32> to vector<8x32xf32>
    %148 = arith.negf %147 : vector<8x32xf32>
    %149 = math.exp %148 : vector<8x32xf32>
    %cst_62 = arith.constant 1.000000e+00 : f32
    %150 = vector.broadcast %cst_62 : f32 to vector<8x32xf32>
    %151 = arith.addf %150, %149 : vector<8x32xf32>
    %152 = arith.divf %150, %151 : vector<8x32xf32>
    %153 = vector.extract_strided_slice %146 {offsets = [0, 32], sizes = [8, 32], strides = [1, 1]} : vector<8x128xf32> to vector<8x32xf32>
    %154 = arith.negf %153 : vector<8x32xf32>
    %155 = math.exp %154 : vector<8x32xf32>
    %cst_63 = arith.constant 1.000000e+00 : f32
    %156 = vector.broadcast %cst_63 : f32 to vector<8x32xf32>
    %157 = arith.addf %156, %155 : vector<8x32xf32>
    %158 = arith.divf %156, %157 : vector<8x32xf32>
    %159 = vector.extract_strided_slice %146 {offsets = [0, 64], sizes = [8, 32], strides = [1, 1]} : vector<8x128xf32> to vector<8x32xf32>
    %160 = math.tanh %159 : vector<8x32xf32>
    %161 = vector.extract_strided_slice %146 {offsets = [0, 96], sizes = [8, 32], strides = [1, 1]} : vector<8x128xf32> to vector<8x32xf32>
    %162 = arith.negf %161 : vector<8x32xf32>
    %163 = math.exp %162 : vector<8x32xf32>
    %cst_64 = arith.constant 1.000000e+00 : f32
    %164 = vector.broadcast %cst_64 : f32 to vector<8x32xf32>
    %165 = arith.addf %164, %163 : vector<8x32xf32>
    %166 = arith.divf %164, %165 : vector<8x32xf32>
    %167 = arith.mulf %158, %105 : vector<8x32xf32>
    %168 = arith.mulf %152, %160 : vector<8x32xf32>
    %169 = arith.addf %167, %168 : vector<8x32xf32>
    %170 = math.tanh %169 : vector<8x32xf32>
    %171 = arith.mulf %166, %170 : vector<8x32xf32>
    %c0_65 = arith.constant 0 : index
    %c5 = arith.constant 5 : index
    %c0_66 = arith.constant 0 : index
    %c0_67 = arith.constant 0 : index
    %172 = vector.load %arg2[%c0_65, %c5, %c0_66, %c0_67] : memref<1x8x8x128xf32, #tpu.memory_space<vmem>>, vector<1x1x8x128xf32>
    %173 = vector.shape_cast %172 : vector<1x1x8x128xf32> to vector<8x128xf32>
    %cst_68 = arith.constant dense<0.000000e+00> : vector<8x128xf32>
    %174 = tpu.matmul %136, %6, %cst_68 {dimension_numbers = #tpu.dot_dimension_numbers<[1], [0], [0], [1], [0, 0, 1, 1], [], []>} : vector<8x32xf32>, vector<32x128xf32>, vector<8x128xf32> -> vector<8x128xf32>
    %175 = arith.addf %173, %174 : vector<8x128xf32>
    %176 = vector.extract_strided_slice %175 {offsets = [0, 0], sizes = [8, 32], strides = [1, 1]} : vector<8x128xf32> to vector<8x32xf32>
    %177 = arith.negf %176 : vector<8x32xf32>
    %178 = math.exp %177 : vector<8x32xf32>
    %cst_69 = arith.constant 1.000000e+00 : f32
    %179 = vector.broadcast %cst_69 : f32 to vector<8x32xf32>
    %180 = arith.addf %179, %178 : vector<8x32xf32>
    %181 = arith.divf %179, %180 : vector<8x32xf32>
    %182 = vector.extract_strided_slice %175 {offsets = [0, 32], sizes = [8, 32], strides = [1, 1]} : vector<8x128xf32> to vector<8x32xf32>
    %183 = arith.negf %182 : vector<8x32xf32>
    %184 = math.exp %183 : vector<8x32xf32>
    %cst_70 = arith.constant 1.000000e+00 : f32
    %185 = vector.broadcast %cst_70 : f32 to vector<8x32xf32>
    %186 = arith.addf %185, %184 : vector<8x32xf32>
    %187 = arith.divf %185, %186 : vector<8x32xf32>
    %188 = vector.extract_strided_slice %175 {offsets = [0, 64], sizes = [8, 32], strides = [1, 1]} : vector<8x128xf32> to vector<8x32xf32>
    %189 = math.tanh %188 : vector<8x32xf32>
    %190 = vector.extract_strided_slice %175 {offsets = [0, 96], sizes = [8, 32], strides = [1, 1]} : vector<8x128xf32> to vector<8x32xf32>
    %191 = arith.negf %190 : vector<8x32xf32>
    %192 = math.exp %191 : vector<8x32xf32>
    %cst_71 = arith.constant 1.000000e+00 : f32
    %193 = vector.broadcast %cst_71 : f32 to vector<8x32xf32>
    %194 = arith.addf %193, %192 : vector<8x32xf32>
    %195 = arith.divf %193, %194 : vector<8x32xf32>
    %196 = arith.mulf %187, %134 : vector<8x32xf32>
    %197 = arith.mulf %181, %189 : vector<8x32xf32>
    %198 = arith.addf %196, %197 : vector<8x32xf32>
    %199 = math.tanh %198 : vector<8x32xf32>
    %200 = arith.mulf %195, %199 : vector<8x32xf32>
    %c2_72 = arith.constant 2 : index
    %c0_73 = arith.constant 0 : index
    %c0_74 = arith.constant 0 : index
    %201 = vector.load %arg4[%c2_72, %c0_73, %c0_74] : memref<8x8x32xf32, #tpu.memory_space<vmem>>, vector<1x8x32xf32>
    %202 = vector.shape_cast %201 : vector<1x8x32xf32> to vector<8x32xf32>
    %203 = vector.shape_cast %171 : vector<8x32xf32> to vector<1x8x32xf32>
    tpu.vector_store %arg4[%c2_72, %c0_73, %c0_74], %203 {strides = array<i32>} : memref<8x8x32xf32, #tpu.memory_space<vmem>>, vector<1x8x32xf32>,
    %c5_75 = arith.constant 5 : index
    %c0_76 = arith.constant 0 : index
    %c0_77 = arith.constant 0 : index
    %204 = vector.load %arg5[%c5_75, %c0_76, %c0_77] : memref<8x8x32xf32, #tpu.memory_space<vmem>>, vector<1x8x32xf32>
    %205 = vector.shape_cast %204 : vector<1x8x32xf32> to vector<8x32xf32>
    %206 = vector.shape_cast %200 : vector<8x32xf32> to vector<1x8x32xf32>
    tpu.vector_store %arg5[%c5_75, %c0_76, %c0_77], %206 {strides = array<i32>} : memref<8x8x32xf32, #tpu.memory_space<vmem>>, vector<1x8x32xf32>,
    %c0_78 = arith.constant 0 : index
    %c3 = arith.constant 3 : index
    %c0_79 = arith.constant 0 : index
    %c0_80 = arith.constant 0 : index
    %207 = vector.load %arg1[%c0_78, %c3, %c0_79, %c0_80] : memref<1x8x8x128xf32, #tpu.memory_space<vmem>>, vector<1x1x8x128xf32>
    %208 = vector.shape_cast %207 : vector<1x1x8x128xf32> to vector<8x128xf32>
    %cst_81 = arith.constant dense<0.000000e+00> : vector<8x128xf32>
    %209 = tpu.matmul %171, %4, %cst_81 {dimension_numbers = #tpu.dot_dimension_numbers<[1], [0], [0], [1], [0, 0, 1, 1], [], []>} : vector<8x32xf32>, vector<32x128xf32>, vector<8x128xf32> -> vector<8x128xf32>
    %210 = arith.addf %208, %209 : vector<8x128xf32>
    %211 = vector.extract_strided_slice %210 {offsets = [0, 0], sizes = [8, 32], strides = [1, 1]} : vector<8x128xf32> to vector<8x32xf32>
    %212 = arith.negf %211 : vector<8x32xf32>
    %213 = math.exp %212 : vector<8x32xf32>
    %cst_82 = arith.constant 1.000000e+00 : f32
    %214 = vector.broadcast %cst_82 : f32 to vector<8x32xf32>
    %215 = arith.addf %214, %213 : vector<8x32xf32>
    %216 = arith.divf %214, %215 : vector<8x32xf32>
    %217 = vector.extract_strided_slice %210 {offsets = [0, 32], sizes = [8, 32], strides = [1, 1]} : vector<8x128xf32> to vector<8x32xf32>
    %218 = arith.negf %217 : vector<8x32xf32>
    %219 = math.exp %218 : vector<8x32xf32>
    %cst_83 = arith.constant 1.000000e+00 : f32
    %220 = vector.broadcast %cst_83 : f32 to vector<8x32xf32>
    %221 = arith.addf %220, %219 : vector<8x32xf32>
    %222 = arith.divf %220, %221 : vector<8x32xf32>
    %223 = vector.extract_strided_slice %210 {offsets = [0, 64], sizes = [8, 32], strides = [1, 1]} : vector<8x128xf32> to vector<8x32xf32>
    %224 = math.tanh %223 : vector<8x32xf32>
    %225 = vector.extract_strided_slice %210 {offsets = [0, 96], sizes = [8, 32], strides = [1, 1]} : vector<8x128xf32> to vector<8x32xf32>
    %226 = arith.negf %225 : vector<8x32xf32>
    %227 = math.exp %226 : vector<8x32xf32>
    %cst_84 = arith.constant 1.000000e+00 : f32
    %228 = vector.broadcast %cst_84 : f32 to vector<8x32xf32>
    %229 = arith.addf %228, %227 : vector<8x32xf32>
    %230 = arith.divf %228, %229 : vector<8x32xf32>
    %231 = arith.mulf %222, %169 : vector<8x32xf32>
    %232 = arith.mulf %216, %224 : vector<8x32xf32>
    %233 = arith.addf %231, %232 : vector<8x32xf32>
    %234 = math.tanh %233 : vector<8x32xf32>
    %235 = arith.mulf %230, %234 : vector<8x32xf32>
    %c0_85 = arith.constant 0 : index
    %c4 = arith.constant 4 : index
    %c0_86 = arith.constant 0 : index
    %c0_87 = arith.constant 0 : index
    %236 = vector.load %arg2[%c0_85, %c4, %c0_86, %c0_87] : memref<1x8x8x128xf32, #tpu.memory_space<vmem>>, vector<1x1x8x128xf32>
    %237 = vector.shape_cast %236 : vector<1x1x8x128xf32> to vector<8x128xf32>
    %cst_88 = arith.constant dense<0.000000e+00> : vector<8x128xf32>
    %238 = tpu.matmul %200, %6, %cst_88 {dimension_numbers = #tpu.dot_dimension_numbers<[1], [0], [0], [1], [0, 0, 1, 1], [], []>} : vector<8x32xf32>, vector<32x128xf32>, vector<8x128xf32> -> vector<8x128xf32>
    %239 = arith.addf %237, %238 : vector<8x128xf32>
    %240 = vector.extract_strided_slice %239 {offsets = [0, 0], sizes = [8, 32], strides = [1, 1]} : vector<8x128xf32> to vector<8x32xf32>
    %241 = arith.negf %240 : vector<8x32xf32>
    %242 = math.exp %241 : vector<8x32xf32>
    %cst_89 = arith.constant 1.000000e+00 : f32
    %243 = vector.broadcast %cst_89 : f32 to vector<8x32xf32>
    %244 = arith.addf %243, %242 : vector<8x32xf32>
    %245 = arith.divf %243, %244 : vector<8x32xf32>
    %246 = vector.extract_strided_slice %239 {offsets = [0, 32], sizes = [8, 32], strides = [1, 1]} : vector<8x128xf32> to vector<8x32xf32>
    %247 = arith.negf %246 : vector<8x32xf32>
    %248 = math.exp %247 : vector<8x32xf32>
    %cst_90 = arith.constant 1.000000e+00 : f32
    %249 = vector.broadcast %cst_90 : f32 to vector<8x32xf32>
    %250 = arith.addf %249, %248 : vector<8x32xf32>
    %251 = arith.divf %249, %250 : vector<8x32xf32>
    %252 = vector.extract_strided_slice %239 {offsets = [0, 64], sizes = [8, 32], strides = [1, 1]} : vector<8x128xf32> to vector<8x32xf32>
    %253 = math.tanh %252 : vector<8x32xf32>
    %254 = vector.extract_strided_slice %239 {offsets = [0, 96], sizes = [8, 32], strides = [1, 1]} : vector<8x128xf32> to vector<8x32xf32>
    %255 = arith.negf %254 : vector<8x32xf32>
    %256 = math.exp %255 : vector<8x32xf32>
    %cst_91 = arith.constant 1.000000e+00 : f32
    %257 = vector.broadcast %cst_91 : f32 to vector<8x32xf32>
    %258 = arith.addf %257, %256 : vector<8x32xf32>
    %259 = arith.divf %257, %258 : vector<8x32xf32>
    %260 = arith.mulf %251, %198 : vector<8x32xf32>
    %261 = arith.mulf %245, %253 : vector<8x32xf32>
    %262 = arith.addf %260, %261 : vector<8x32xf32>
    %263 = math.tanh %262 : vector<8x32xf32>
    %264 = arith.mulf %259, %263 : vector<8x32xf32>
    %c3_92 = arith.constant 3 : index
    %c0_93 = arith.constant 0 : index
    %c0_94 = arith.constant 0 : index
    %265 = vector.load %arg4[%c3_92, %c0_93, %c0_94] : memref<8x8x32xf32, #tpu.memory_space<vmem>>, vector<1x8x32xf32>
    %266 = vector.shape_cast %265 : vector<1x8x32xf32> to vector<8x32xf32>
    %267 = vector.shape_cast %235 : vector<8x32xf32> to vector<1x8x32xf32>
    tpu.vector_store %arg4[%c3_92, %c0_93, %c0_94], %267 {strides = array<i32>} : memref<8x8x32xf32, #tpu.memory_space<vmem>>, vector<1x8x32xf32>,
    %c4_95 = arith.constant 4 : index
    %c0_96 = arith.constant 0 : index
    %c0_97 = arith.constant 0 : index
    %268 = vector.load %arg5[%c4_95, %c0_96, %c0_97] : memref<8x8x32xf32, #tpu.memory_space<vmem>>, vector<1x8x32xf32>
    %269 = vector.shape_cast %268 : vector<1x8x32xf32> to vector<8x32xf32>
    %270 = vector.shape_cast %264 : vector<8x32xf32> to vector<1x8x32xf32>
    tpu.vector_store %arg5[%c4_95, %c0_96, %c0_97], %270 {strides = array<i32>} : memref<8x8x32xf32, #tpu.memory_space<vmem>>, vector<1x8x32xf32>,
    %c0_98 = arith.constant 0 : index
    %c4_99 = arith.constant 4 : index
    %c0_100 = arith.constant 0 : index
    %c0_101 = arith.constant 0 : index
    %271 = vector.load %arg1[%c0_98, %c4_99, %c0_100, %c0_101] : memref<1x8x8x128xf32, #tpu.memory_space<vmem>>, vector<1x1x8x128xf32>
    %272 = vector.shape_cast %271 : vector<1x1x8x128xf32> to vector<8x128xf32>
    %cst_102 = arith.constant dense<0.000000e+00> : vector<8x128xf32>
    %273 = tpu.matmul %235, %4, %cst_102 {dimension_numbers = #tpu.dot_dimension_numbers<[1], [0], [0], [1], [0, 0, 1, 1], [], []>} : vector<8x32xf32>, vector<32x128xf32>, vector<8x128xf32> -> vector<8x128xf32>
    %274 = arith.addf %272, %273 : vector<8x128xf32>
    %275 = vector.extract_strided_slice %274 {offsets = [0, 0], sizes = [8, 32], strides = [1, 1]} : vector<8x128xf32> to vector<8x32xf32>
    %276 = arith.negf %275 : vector<8x32xf32>
    %277 = math.exp %276 : vector<8x32xf32>
    %cst_103 = arith.constant 1.000000e+00 : f32
    %278 = vector.broadcast %cst_103 : f32 to vector<8x32xf32>
    %279 = arith.addf %278, %277 : vector<8x32xf32>
    %280 = arith.divf %278, %279 : vector<8x32xf32>
    %281 = vector.extract_strided_slice %274 {offsets = [0, 32], sizes = [8, 32], strides = [1, 1]} : vector<8x128xf32> to vector<8x32xf32>
    %282 = arith.negf %281 : vector<8x32xf32>
    %283 = math.exp %282 : vector<8x32xf32>
    %cst_104 = arith.constant 1.000000e+00 : f32
    %284 = vector.broadcast %cst_104 : f32 to vector<8x32xf32>
    %285 = arith.addf %284, %283 : vector<8x32xf32>
    %286 = arith.divf %284, %285 : vector<8x32xf32>
    %287 = vector.extract_strided_slice %274 {offsets = [0, 64], sizes = [8, 32], strides = [1, 1]} : vector<8x128xf32> to vector<8x32xf32>
    %288 = math.tanh %287 : vector<8x32xf32>
    %289 = vector.extract_strided_slice %274 {offsets = [0, 96], sizes = [8, 32], strides = [1, 1]} : vector<8x128xf32> to vector<8x32xf32>
    %290 = arith.negf %289 : vector<8x32xf32>
    %291 = math.exp %290 : vector<8x32xf32>
    %cst_105 = arith.constant 1.000000e+00 : f32
    %292 = vector.broadcast %cst_105 : f32 to vector<8x32xf32>
    %293 = arith.addf %292, %291 : vector<8x32xf32>
    %294 = arith.divf %292, %293 : vector<8x32xf32>
    %295 = arith.mulf %286, %233 : vector<8x32xf32>
    %296 = arith.mulf %280, %288 : vector<8x32xf32>
    %297 = arith.addf %295, %296 : vector<8x32xf32>
    %298 = math.tanh %297 : vector<8x32xf32>
    %299 = arith.mulf %294, %298 : vector<8x32xf32>
    %c0_106 = arith.constant 0 : index
    %c3_107 = arith.constant 3 : index
    %c0_108 = arith.constant 0 : index
    %c0_109 = arith.constant 0 : index
    %300 = vector.load %arg2[%c0_106, %c3_107, %c0_108, %c0_109] : memref<1x8x8x128xf32, #tpu.memory_space<vmem>>, vector<1x1x8x128xf32>
    %301 = vector.shape_cast %300 : vector<1x1x8x128xf32> to vector<8x128xf32>
    %cst_110 = arith.constant dense<0.000000e+00> : vector<8x128xf32>
    %302 = tpu.matmul %264, %6, %cst_110 {dimension_numbers = #tpu.dot_dimension_numbers<[1], [0], [0], [1], [0, 0, 1, 1], [], []>} : vector<8x32xf32>, vector<32x128xf32>, vector<8x128xf32> -> vector<8x128xf32>
    %303 = arith.addf %301, %302 : vector<8x128xf32>
    %304 = vector.extract_strided_slice %303 {offsets = [0, 0], sizes = [8, 32], strides = [1, 1]} : vector<8x128xf32> to vector<8x32xf32>
    %305 = arith.negf %304 : vector<8x32xf32>
    %306 = math.exp %305 : vector<8x32xf32>
    %cst_111 = arith.constant 1.000000e+00 : f32
    %307 = vector.broadcast %cst_111 : f32 to vector<8x32xf32>
    %308 = arith.addf %307, %306 : vector<8x32xf32>
    %309 = arith.divf %307, %308 : vector<8x32xf32>
    %310 = vector.extract_strided_slice %303 {offsets = [0, 32], sizes = [8, 32], strides = [1, 1]} : vector<8x128xf32> to vector<8x32xf32>
    %311 = arith.negf %310 : vector<8x32xf32>
    %312 = math.exp %311 : vector<8x32xf32>
    %cst_112 = arith.constant 1.000000e+00 : f32
    %313 = vector.broadcast %cst_112 : f32 to vector<8x32xf32>
    %314 = arith.addf %313, %312 : vector<8x32xf32>
    %315 = arith.divf %313, %314 : vector<8x32xf32>
    %316 = vector.extract_strided_slice %303 {offsets = [0, 64], sizes = [8, 32], strides = [1, 1]} : vector<8x128xf32> to vector<8x32xf32>
    %317 = math.tanh %316 : vector<8x32xf32>
    %318 = vector.extract_strided_slice %303 {offsets = [0, 96], sizes = [8, 32], strides = [1, 1]} : vector<8x128xf32> to vector<8x32xf32>
    %319 = arith.negf %318 : vector<8x32xf32>
    %320 = math.exp %319 : vector<8x32xf32>
    %cst_113 = arith.constant 1.000000e+00 : f32
    %321 = vector.broadcast %cst_113 : f32 to vector<8x32xf32>
    %322 = arith.addf %321, %320 : vector<8x32xf32>
    %323 = arith.divf %321, %322 : vector<8x32xf32>
    %324 = arith.mulf %315, %262 : vector<8x32xf32>
    %325 = arith.mulf %309, %317 : vector<8x32xf32>
    %326 = arith.addf %324, %325 : vector<8x32xf32>
    %327 = math.tanh %326 : vector<8x32xf32>
    %328 = arith.mulf %323, %327 : vector<8x32xf32>
    %c4_114 = arith.constant 4 : index
    %c0_115 = arith.constant 0 : index
    %c0_116 = arith.constant 0 : index
    %329 = vector.load %arg4[%c4_114, %c0_115, %c0_116] : memref<8x8x32xf32, #tpu.memory_space<vmem>>, vector<1x8x32xf32>
    %330 = vector.shape_cast %329 : vector<1x8x32xf32> to vector<8x32xf32>
    %331 = vector.shape_cast %299 : vector<8x32xf32> to vector<1x8x32xf32>
    tpu.vector_store %arg4[%c4_114, %c0_115, %c0_116], %331 {strides = array<i32>} : memref<8x8x32xf32, #tpu.memory_space<vmem>>, vector<1x8x32xf32>,
    %c3_117 = arith.constant 3 : index
    %c0_118 = arith.constant 0 : index
    %c0_119 = arith.constant 0 : index
    %332 = vector.load %arg5[%c3_117, %c0_118, %c0_119] : memref<8x8x32xf32, #tpu.memory_space<vmem>>, vector<1x8x32xf32>
    %333 = vector.shape_cast %332 : vector<1x8x32xf32> to vector<8x32xf32>
    %334 = vector.shape_cast %328 : vector<8x32xf32> to vector<1x8x32xf32>
    tpu.vector_store %arg5[%c3_117, %c0_118, %c0_119], %334 {strides = array<i32>} : memref<8x8x32xf32, #tpu.memory_space<vmem>>, vector<1x8x32xf32>,
    %c0_120 = arith.constant 0 : index
    %c5_121 = arith.constant 5 : index
    %c0_122 = arith.constant 0 : index
    %c0_123 = arith.constant 0 : index
    %335 = vector.load %arg1[%c0_120, %c5_121, %c0_122, %c0_123] : memref<1x8x8x128xf32, #tpu.memory_space<vmem>>, vector<1x1x8x128xf32>
    %336 = vector.shape_cast %335 : vector<1x1x8x128xf32> to vector<8x128xf32>
    %cst_124 = arith.constant dense<0.000000e+00> : vector<8x128xf32>
    %337 = tpu.matmul %299, %4, %cst_124 {dimension_numbers = #tpu.dot_dimension_numbers<[1], [0], [0], [1], [0, 0, 1, 1], [], []>} : vector<8x32xf32>, vector<32x128xf32>, vector<8x128xf32> -> vector<8x128xf32>
    %338 = arith.addf %336, %337 : vector<8x128xf32>
    %339 = vector.extract_strided_slice %338 {offsets = [0, 0], sizes = [8, 32], strides = [1, 1]} : vector<8x128xf32> to vector<8x32xf32>
    %340 = arith.negf %339 : vector<8x32xf32>
    %341 = math.exp %340 : vector<8x32xf32>
    %cst_125 = arith.constant 1.000000e+00 : f32
    %342 = vector.broadcast %cst_125 : f32 to vector<8x32xf32>
    %343 = arith.addf %342, %341 : vector<8x32xf32>
    %344 = arith.divf %342, %343 : vector<8x32xf32>
    %345 = vector.extract_strided_slice %338 {offsets = [0, 32], sizes = [8, 32], strides = [1, 1]} : vector<8x128xf32> to vector<8x32xf32>
    %346 = arith.negf %345 : vector<8x32xf32>
    %347 = math.exp %346 : vector<8x32xf32>
    %cst_126 = arith.constant 1.000000e+00 : f32
    %348 = vector.broadcast %cst_126 : f32 to vector<8x32xf32>
    %349 = arith.addf %348, %347 : vector<8x32xf32>
    %350 = arith.divf %348, %349 : vector<8x32xf32>
    %351 = vector.extract_strided_slice %338 {offsets = [0, 64], sizes = [8, 32], strides = [1, 1]} : vector<8x128xf32> to vector<8x32xf32>
    %352 = math.tanh %351 : vector<8x32xf32>
    %353 = vector.extract_strided_slice %338 {offsets = [0, 96], sizes = [8, 32], strides = [1, 1]} : vector<8x128xf32> to vector<8x32xf32>
    %354 = arith.negf %353 : vector<8x32xf32>
    %355 = math.exp %354 : vector<8x32xf32>
    %cst_127 = arith.constant 1.000000e+00 : f32
    %356 = vector.broadcast %cst_127 : f32 to vector<8x32xf32>
    %357 = arith.addf %356, %355 : vector<8x32xf32>
    %358 = arith.divf %356, %357 : vector<8x32xf32>
    %359 = arith.mulf %350, %297 : vector<8x32xf32>
    %360 = arith.mulf %344, %352 : vector<8x32xf32>
    %361 = arith.addf %359, %360 : vector<8x32xf32>
    %362 = math.tanh %361 : vector<8x32xf32>
    %363 = arith.mulf %358, %362 : vector<8x32xf32>
    %c0_128 = arith.constant 0 : index
    %c2_129 = arith.constant 2 : index
    %c0_130 = arith.constant 0 : index
    %c0_131 = arith.constant 0 : index
    %364 = vector.load %arg2[%c0_128, %c2_129, %c0_130, %c0_131] : memref<1x8x8x128xf32, #tpu.memory_space<vmem>>, vector<1x1x8x128xf32>
    %365 = vector.shape_cast %364 : vector<1x1x8x128xf32> to vector<8x128xf32>
    %cst_132 = arith.constant dense<0.000000e+00> : vector<8x128xf32>
    %366 = tpu.matmul %328, %6, %cst_132 {dimension_numbers = #tpu.dot_dimension_numbers<[1], [0], [0], [1], [0, 0, 1, 1], [], []>} : vector<8x32xf32>, vector<32x128xf32>, vector<8x128xf32> -> vector<8x128xf32>
    %367 = arith.addf %365, %366 : vector<8x128xf32>
    %368 = vector.extract_strided_slice %367 {offsets = [0, 0], sizes = [8, 32], strides = [1, 1]} : vector<8x128xf32> to vector<8x32xf32>
    %369 = arith.negf %368 : vector<8x32xf32>
    %370 = math.exp %369 : vector<8x32xf32>
    %cst_133 = arith.constant 1.000000e+00 : f32
    %371 = vector.broadcast %cst_133 : f32 to vector<8x32xf32>
    %372 = arith.addf %371, %370 : vector<8x32xf32>
    %373 = arith.divf %371, %372 : vector<8x32xf32>
    %374 = vector.extract_strided_slice %367 {offsets = [0, 32], sizes = [8, 32], strides = [1, 1]} : vector<8x128xf32> to vector<8x32xf32>
    %375 = arith.negf %374 : vector<8x32xf32>
    %376 = math.exp %375 : vector<8x32xf32>
    %cst_134 = arith.constant 1.000000e+00 : f32
    %377 = vector.broadcast %cst_134 : f32 to vector<8x32xf32>
    %378 = arith.addf %377, %376 : vector<8x32xf32>
    %379 = arith.divf %377, %378 : vector<8x32xf32>
    %380 = vector.extract_strided_slice %367 {offsets = [0, 64], sizes = [8, 32], strides = [1, 1]} : vector<8x128xf32> to vector<8x32xf32>
    %381 = math.tanh %380 : vector<8x32xf32>
    %382 = vector.extract_strided_slice %367 {offsets = [0, 96], sizes = [8, 32], strides = [1, 1]} : vector<8x128xf32> to vector<8x32xf32>
    %383 = arith.negf %382 : vector<8x32xf32>
    %384 = math.exp %383 : vector<8x32xf32>
    %cst_135 = arith.constant 1.000000e+00 : f32
    %385 = vector.broadcast %cst_135 : f32 to vector<8x32xf32>
    %386 = arith.addf %385, %384 : vector<8x32xf32>
    %387 = arith.divf %385, %386 : vector<8x32xf32>
    %388 = arith.mulf %379, %326 : vector<8x32xf32>
    %389 = arith.mulf %373, %381 : vector<8x32xf32>
    %390 = arith.addf %388, %389 : vector<8x32xf32>
    %391 = math.tanh %390 : vector<8x32xf32>
    %392 = arith.mulf %387, %391 : vector<8x32xf32>
    %c5_136 = arith.constant 5 : index
    %c0_137 = arith.constant 0 : index
    %c0_138 = arith.constant 0 : index
    %393 = vector.load %arg4[%c5_136, %c0_137, %c0_138] : memref<8x8x32xf32, #tpu.memory_space<vmem>>, vector<1x8x32xf32>
    %394 = vector.shape_cast %393 : vector<1x8x32xf32> to vector<8x32xf32>
    %395 = vector.shape_cast %363 : vector<8x32xf32> to vector<1x8x32xf32>
    tpu.vector_store %arg4[%c5_136, %c0_137, %c0_138], %395 {strides = array<i32>} : memref<8x8x32xf32, #tpu.memory_space<vmem>>, vector<1x8x32xf32>,
    %c2_139 = arith.constant 2 : index
    %c0_140 = arith.constant 0 : index
    %c0_141 = arith.constant 0 : index
    %396 = vector.load %arg5[%c2_139, %c0_140, %c0_141] : memref<8x8x32xf32, #tpu.memory_space<vmem>>, vector<1x8x32xf32>
    %397 = vector.shape_cast %396 : vector<1x8x32xf32> to vector<8x32xf32>
    %398 = vector.shape_cast %392 : vector<8x32xf32> to vector<1x8x32xf32>
    tpu.vector_store %arg5[%c2_139, %c0_140, %c0_141], %398 {strides = array<i32>} : memref<8x8x32xf32, #tpu.memory_space<vmem>>, vector<1x8x32xf32>,
    %c0_142 = arith.constant 0 : index
    %c6_143 = arith.constant 6 : index
    %c0_144 = arith.constant 0 : index
    %c0_145 = arith.constant 0 : index
    %399 = vector.load %arg1[%c0_142, %c6_143, %c0_144, %c0_145] : memref<1x8x8x128xf32, #tpu.memory_space<vmem>>, vector<1x1x8x128xf32>
    %400 = vector.shape_cast %399 : vector<1x1x8x128xf32> to vector<8x128xf32>
    %cst_146 = arith.constant dense<0.000000e+00> : vector<8x128xf32>
    %401 = tpu.matmul %363, %4, %cst_146 {dimension_numbers = #tpu.dot_dimension_numbers<[1], [0], [0], [1], [0, 0, 1, 1], [], []>} : vector<8x32xf32>, vector<32x128xf32>, vector<8x128xf32> -> vector<8x128xf32>
    %402 = arith.addf %400, %401 : vector<8x128xf32>
    %403 = vector.extract_strided_slice %402 {offsets = [0, 0], sizes = [8, 32], strides = [1, 1]} : vector<8x128xf32> to vector<8x32xf32>
    %404 = arith.negf %403 : vector<8x32xf32>
    %405 = math.exp %404 : vector<8x32xf32>
    %cst_147 = arith.constant 1.000000e+00 : f32
    %406 = vector.broadcast %cst_147 : f32 to vector<8x32xf32>
    %407 = arith.addf %406, %405 : vector<8x32xf32>
    %408 = arith.divf %406, %407 : vector<8x32xf32>
    %409 = vector.extract_strided_slice %402 {offsets = [0, 32], sizes = [8, 32], strides = [1, 1]} : vector<8x128xf32> to vector<8x32xf32>
    %410 = arith.negf %409 : vector<8x32xf32>
    %411 = math.exp %410 : vector<8x32xf32>
    %cst_148 = arith.constant 1.000000e+00 : f32
    %412 = vector.broadcast %cst_148 : f32 to vector<8x32xf32>
    %413 = arith.addf %412, %411 : vector<8x32xf32>
    %414 = arith.divf %412, %413 : vector<8x32xf32>
    %415 = vector.extract_strided_slice %402 {offsets = [0, 64], sizes = [8, 32], strides = [1, 1]} : vector<8x128xf32> to vector<8x32xf32>
    %416 = math.tanh %415 : vector<8x32xf32>
    %417 = vector.extract_strided_slice %402 {offsets = [0, 96], sizes = [8, 32], strides = [1, 1]} : vector<8x128xf32> to vector<8x32xf32>
    %418 = arith.negf %417 : vector<8x32xf32>
    %419 = math.exp %418 : vector<8x32xf32>
    %cst_149 = arith.constant 1.000000e+00 : f32
    %420 = vector.broadcast %cst_149 : f32 to vector<8x32xf32>
    %421 = arith.addf %420, %419 : vector<8x32xf32>
    %422 = arith.divf %420, %421 : vector<8x32xf32>
    %423 = arith.mulf %414, %361 : vector<8x32xf32>
    %424 = arith.mulf %408, %416 : vector<8x32xf32>
    %425 = arith.addf %423, %424 : vector<8x32xf32>
    %426 = math.tanh %425 : vector<8x32xf32>
    %427 = arith.mulf %422, %426 : vector<8x32xf32>
    %c0_150 = arith.constant 0 : index
    %c1_151 = arith.constant 1 : index
    %c0_152 = arith.constant 0 : index
    %c0_153 = arith.constant 0 : index
    %428 = vector.load %arg2[%c0_150, %c1_151, %c0_152, %c0_153] : memref<1x8x8x128xf32, #tpu.memory_space<vmem>>, vector<1x1x8x128xf32>
    %429 = vector.shape_cast %428 : vector<1x1x8x128xf32> to vector<8x128xf32>
    %cst_154 = arith.constant dense<0.000000e+00> : vector<8x128xf32>
    %430 = tpu.matmul %392, %6, %cst_154 {dimension_numbers = #tpu.dot_dimension_numbers<[1], [0], [0], [1], [0, 0, 1, 1], [], []>} : vector<8x32xf32>, vector<32x128xf32>, vector<8x128xf32> -> vector<8x128xf32>
    %431 = arith.addf %429, %430 : vector<8x128xf32>
    %432 = vector.extract_strided_slice %431 {offsets = [0, 0], sizes = [8, 32], strides = [1, 1]} : vector<8x128xf32> to vector<8x32xf32>
    %433 = arith.negf %432 : vector<8x32xf32>
    %434 = math.exp %433 : vector<8x32xf32>
    %cst_155 = arith.constant 1.000000e+00 : f32
    %435 = vector.broadcast %cst_155 : f32 to vector<8x32xf32>
    %436 = arith.addf %435, %434 : vector<8x32xf32>
    %437 = arith.divf %435, %436 : vector<8x32xf32>
    %438 = vector.extract_strided_slice %431 {offsets = [0, 32], sizes = [8, 32], strides = [1, 1]} : vector<8x128xf32> to vector<8x32xf32>
    %439 = arith.negf %438 : vector<8x32xf32>
    %440 = math.exp %439 : vector<8x32xf32>
    %cst_156 = arith.constant 1.000000e+00 : f32
    %441 = vector.broadcast %cst_156 : f32 to vector<8x32xf32>
    %442 = arith.addf %441, %440 : vector<8x32xf32>
    %443 = arith.divf %441, %442 : vector<8x32xf32>
    %444 = vector.extract_strided_slice %431 {offsets = [0, 64], sizes = [8, 32], strides = [1, 1]} : vector<8x128xf32> to vector<8x32xf32>
    %445 = math.tanh %444 : vector<8x32xf32>
    %446 = vector.extract_strided_slice %431 {offsets = [0, 96], sizes = [8, 32], strides = [1, 1]} : vector<8x128xf32> to vector<8x32xf32>
    %447 = arith.negf %446 : vector<8x32xf32>
    %448 = math.exp %447 : vector<8x32xf32>
    %cst_157 = arith.constant 1.000000e+00 : f32
    %449 = vector.broadcast %cst_157 : f32 to vector<8x32xf32>
    %450 = arith.addf %449, %448 : vector<8x32xf32>
    %451 = arith.divf %449, %450 : vector<8x32xf32>
    %452 = arith.mulf %443, %390 : vector<8x32xf32>
    %453 = arith.mulf %437, %445 : vector<8x32xf32>
    %454 = arith.addf %452, %453 : vector<8x32xf32>
    %455 = math.tanh %454 : vector<8x32xf32>
    %456 = arith.mulf %451, %455 : vector<8x32xf32>
    %c6_158 = arith.constant 6 : index
    %c0_159 = arith.constant 0 : index
    %c0_160 = arith.constant 0 : index
    %457 = vector.load %arg4[%c6_158, %c0_159, %c0_160] : memref<8x8x32xf32, #tpu.memory_space<vmem>>, vector<1x8x32xf32>
    %458 = vector.shape_cast %457 : vector<1x8x32xf32> to vector<8x32xf32>
    %459 = vector.shape_cast %427 : vector<8x32xf32> to vector<1x8x32xf32>
    tpu.vector_store %arg4[%c6_158, %c0_159, %c0_160], %459 {strides = array<i32>} : memref<8x8x32xf32, #tpu.memory_space<vmem>>, vector<1x8x32xf32>,
    %c1_161 = arith.constant 1 : index
    %c0_162 = arith.constant 0 : index
    %c0_163 = arith.constant 0 : index
    %460 = vector.load %arg5[%c1_161, %c0_162, %c0_163] : memref<8x8x32xf32, #tpu.memory_space<vmem>>, vector<1x8x32xf32>
    %461 = vector.shape_cast %460 : vector<1x8x32xf32> to vector<8x32xf32>
    %462 = vector.shape_cast %456 : vector<8x32xf32> to vector<1x8x32xf32>
    tpu.vector_store %arg5[%c1_161, %c0_162, %c0_163], %462 {strides = array<i32>} : memref<8x8x32xf32, #tpu.memory_space<vmem>>, vector<1x8x32xf32>,
    %c0_164 = arith.constant 0 : index
    %c7_165 = arith.constant 7 : index
    %c0_166 = arith.constant 0 : index
    %c0_167 = arith.constant 0 : index
    %463 = vector.load %arg1[%c0_164, %c7_165, %c0_166, %c0_167] : memref<1x8x8x128xf32, #tpu.memory_space<vmem>>, vector<1x1x8x128xf32>
    %464 = vector.shape_cast %463 : vector<1x1x8x128xf32> to vector<8x128xf32>
    %cst_168 = arith.constant dense<0.000000e+00> : vector<8x128xf32>
    %465 = tpu.matmul %427, %4, %cst_168 {dimension_numbers = #tpu.dot_dimension_numbers<[1], [0], [0], [1], [0, 0, 1, 1], [], []>} : vector<8x32xf32>, vector<32x128xf32>, vector<8x128xf32> -> vector<8x128xf32>
    %466 = arith.addf %464, %465 : vector<8x128xf32>
    %467 = vector.extract_strided_slice %466 {offsets = [0, 0], sizes = [8, 32], strides = [1, 1]} : vector<8x128xf32> to vector<8x32xf32>
    %468 = arith.negf %467 : vector<8x32xf32>
    %469 = math.exp %468 : vector<8x32xf32>
    %cst_169 = arith.constant 1.000000e+00 : f32
    %470 = vector.broadcast %cst_169 : f32 to vector<8x32xf32>
    %471 = arith.addf %470, %469 : vector<8x32xf32>
    %472 = arith.divf %470, %471 : vector<8x32xf32>
    %473 = vector.extract_strided_slice %466 {offsets = [0, 32], sizes = [8, 32], strides = [1, 1]} : vector<8x128xf32> to vector<8x32xf32>
    %474 = arith.negf %473 : vector<8x32xf32>
    %475 = math.exp %474 : vector<8x32xf32>
    %cst_170 = arith.constant 1.000000e+00 : f32
    %476 = vector.broadcast %cst_170 : f32 to vector<8x32xf32>
    %477 = arith.addf %476, %475 : vector<8x32xf32>
    %478 = arith.divf %476, %477 : vector<8x32xf32>
    %479 = vector.extract_strided_slice %466 {offsets = [0, 64], sizes = [8, 32], strides = [1, 1]} : vector<8x128xf32> to vector<8x32xf32>
    %480 = math.tanh %479 : vector<8x32xf32>
    %481 = vector.extract_strided_slice %466 {offsets = [0, 96], sizes = [8, 32], strides = [1, 1]} : vector<8x128xf32> to vector<8x32xf32>
    %482 = arith.negf %481 : vector<8x32xf32>
    %483 = math.exp %482 : vector<8x32xf32>
    %cst_171 = arith.constant 1.000000e+00 : f32
    %484 = vector.broadcast %cst_171 : f32 to vector<8x32xf32>
    %485 = arith.addf %484, %483 : vector<8x32xf32>
    %486 = arith.divf %484, %485 : vector<8x32xf32>
    %487 = arith.mulf %478, %425 : vector<8x32xf32>
    %488 = arith.mulf %472, %480 : vector<8x32xf32>
    %489 = arith.addf %487, %488 : vector<8x32xf32>
    %490 = math.tanh %489 : vector<8x32xf32>
    %491 = arith.mulf %486, %490 : vector<8x32xf32>
    %c0_172 = arith.constant 0 : index
    %c0_173 = arith.constant 0 : index
    %c0_174 = arith.constant 0 : index
    %c0_175 = arith.constant 0 : index
    %492 = vector.load %arg2[%c0_172, %c0_173, %c0_174, %c0_175] : memref<1x8x8x128xf32, #tpu.memory_space<vmem>>, vector<1x1x8x128xf32>
    %493 = vector.shape_cast %492 : vector<1x1x8x128xf32> to vector<8x128xf32>
    %cst_176 = arith.constant dense<0.000000e+00> : vector<8x128xf32>
    %494 = tpu.matmul %456, %6, %cst_176 {dimension_numbers = #tpu.dot_dimension_numbers<[1], [0], [0], [1], [0, 0, 1, 1], [], []>} : vector<8x32xf32>, vector<32x128xf32>, vector<8x128xf32> -> vector<8x128xf32>
    %495 = arith.addf %493, %494 : vector<8x128xf32>
    %496 = vector.extract_strided_slice %495 {offsets = [0, 0], sizes = [8, 32], strides = [1, 1]} : vector<8x128xf32> to vector<8x32xf32>
    %497 = arith.negf %496 : vector<8x32xf32>
    %498 = math.exp %497 : vector<8x32xf32>
    %cst_177 = arith.constant 1.000000e+00 : f32
    %499 = vector.broadcast %cst_177 : f32 to vector<8x32xf32>
    %500 = arith.addf %499, %498 : vector<8x32xf32>
    %501 = arith.divf %499, %500 : vector<8x32xf32>
    %502 = vector.extract_strided_slice %495 {offsets = [0, 32], sizes = [8, 32], strides = [1, 1]} : vector<8x128xf32> to vector<8x32xf32>
    %503 = arith.negf %502 : vector<8x32xf32>
    %504 = math.exp %503 : vector<8x32xf32>
    %cst_178 = arith.constant 1.000000e+00 : f32
    %505 = vector.broadcast %cst_178 : f32 to vector<8x32xf32>
    %506 = arith.addf %505, %504 : vector<8x32xf32>
    %507 = arith.divf %505, %506 : vector<8x32xf32>
    %508 = vector.extract_strided_slice %495 {offsets = [0, 64], sizes = [8, 32], strides = [1, 1]} : vector<8x128xf32> to vector<8x32xf32>
    %509 = math.tanh %508 : vector<8x32xf32>
    %510 = vector.extract_strided_slice %495 {offsets = [0, 96], sizes = [8, 32], strides = [1, 1]} : vector<8x128xf32> to vector<8x32xf32>
    %511 = arith.negf %510 : vector<8x32xf32>
    %512 = math.exp %511 : vector<8x32xf32>
    %cst_179 = arith.constant 1.000000e+00 : f32
    %513 = vector.broadcast %cst_179 : f32 to vector<8x32xf32>
    %514 = arith.addf %513, %512 : vector<8x32xf32>
    %515 = arith.divf %513, %514 : vector<8x32xf32>
    %516 = arith.mulf %507, %454 : vector<8x32xf32>
    %517 = arith.mulf %501, %509 : vector<8x32xf32>
    %518 = arith.addf %516, %517 : vector<8x32xf32>
    %519 = math.tanh %518 : vector<8x32xf32>
    %520 = arith.mulf %515, %519 : vector<8x32xf32>
    %c7_180 = arith.constant 7 : index
    %c0_181 = arith.constant 0 : index
    %c0_182 = arith.constant 0 : index
    %521 = vector.load %arg4[%c7_180, %c0_181, %c0_182] : memref<8x8x32xf32, #tpu.memory_space<vmem>>, vector<1x8x32xf32>
    %522 = vector.shape_cast %521 : vector<1x8x32xf32> to vector<8x32xf32>
    %523 = vector.shape_cast %491 : vector<8x32xf32> to vector<1x8x32xf32>
    tpu.vector_store %arg4[%c7_180, %c0_181, %c0_182], %523 {strides = array<i32>} : memref<8x8x32xf32, #tpu.memory_space<vmem>>, vector<1x8x32xf32>,
    %c0_183 = arith.constant 0 : index
    %c0_184 = arith.constant 0 : index
    %c0_185 = arith.constant 0 : index
    %524 = vector.load %arg5[%c0_183, %c0_184, %c0_185] : memref<8x8x32xf32, #tpu.memory_space<vmem>>, vector<1x8x32xf32>
    %525 = vector.shape_cast %524 : vector<1x8x32xf32> to vector<8x32xf32>
    %526 = vector.shape_cast %520 : vector<8x32xf32> to vector<1x8x32xf32>
    tpu.vector_store %arg5[%c0_183, %c0_184, %c0_185], %526 {strides = array<i32>} : memref<8x8x32xf32, #tpu.memory_space<vmem>>, vector<1x8x32xf32>,
    %c0_186 = arith.constant 0 : index
    %c0_187 = arith.constant 0 : index
    %c0_188 = arith.constant 0 : index
    %527 = vector.load %arg6[%c0_186, %c0_187, %c0_188] : memref<2x8x32xf32, #tpu.memory_space<vmem>>, vector<1x8x32xf32>
    %528 = vector.shape_cast %527 : vector<1x8x32xf32> to vector<8x32xf32>
    %529 = vector.shape_cast %491 : vector<8x32xf32> to vector<1x8x32xf32>
    tpu.vector_store %arg6[%c0_186, %c0_187, %c0_188], %529 {strides = array<i32>} : memref<2x8x32xf32, #tpu.memory_space<vmem>>, vector<1x8x32xf32>,
    %c0_189 = arith.constant 0 : index
    %c0_190 = arith.constant 0 : index
    %c0_191 = arith.constant 0 : index
    %530 = vector.load %arg7[%c0_189, %c0_190, %c0_191] : memref<2x8x32xf32, #tpu.memory_space<vmem>>, vector<1x8x32xf32>
    %531 = vector.shape_cast %530 : vector<1x8x32xf32> to vector<8x32xf32>
    %532 = vector.shape_cast %489 : vector<8x32xf32> to vector<1x8x32xf32>
    tpu.vector_store %arg7[%c0_189, %c0_190, %c0_191], %532 {strides = array<i32>} : memref<2x8x32xf32, #tpu.memory_space<vmem>>, vector<1x8x32xf32>,
    %c1_192 = arith.constant 1 : index
    %c0_193 = arith.constant 0 : index
    %c0_194 = arith.constant 0 : index
    %533 = vector.load %arg6[%c1_192, %c0_193, %c0_194] : memref<2x8x32xf32, #tpu.memory_space<vmem>>, vector<1x8x32xf32>
    %534 = vector.shape_cast %533 : vector<1x8x32xf32> to vector<8x32xf32>
    %535 = vector.shape_cast %520 : vector<8x32xf32> to vector<1x8x32xf32>
    tpu.vector_store %arg6[%c1_192, %c0_193, %c0_194], %535 {strides = array<i32>} : memref<2x8x32xf32, #tpu.memory_space<vmem>>, vector<1x8x32xf32>,
    %c1_195 = arith.constant 1 : index
    %c0_196 = arith.constant 0 : index
    %c0_197 = arith.constant 0 : index
    %536 = vector.load %arg7[%c1_195, %c0_196, %c0_197] : memref<2x8x32xf32, #tpu.memory_space<vmem>>, vector<1x8x32xf32>
    %537 = vector.shape_cast %536 : vector<1x8x32xf32> to vector<8x32xf32>
    %538 = vector.shape_cast %518 : vector<8x32xf32> to vector<1x8x32xf32>
    tpu.vector_store %arg7[%c1_195, %c0_196, %c0_197], %538 {strides = array<i32>} : memref<2x8x32xf32, #tpu.memory_space<vmem>>, vector<1x8x32xf32>,
    return
  }
  func.func @transform_0(%arg0: i32) -> (i32, i32, i32, i32) {
    %c0_i32 = arith.constant 0 : i32
    %c0_i32_0 = arith.constant 0 : i32
    %c0_i32_1 = arith.constant 0 : i32
    %c0_i32_2 = arith.constant 0 : i32
    return %c0_i32, %arg0, %c0_i32_0, %c0_i32_1 : i32, i32, i32, i32
  }
  func.func @transform_1(%arg0: i32) -> (i32, i32, i32, i32) {
    %c0_i32 = arith.constant 0 : i32
    %0 = arith.subi %c0_i32, %arg0 : i32
    %c1_i32 = arith.constant 1 : i32
    %c0_i32_0 = arith.constant 0 : i32
    %c0_i32_1 = arith.constant 0 : i32
    %c0_i32_2 = arith.constant 0 : i32
    return %c1_i32, %0, %c0_i32_0, %c0_i32_1 : i32, i32, i32, i32
  }
  func.func @transform_2(%arg0: i32) -> (i32, i32, i32) {
    %c0_i32 = arith.constant 0 : i32
    %c0_i32_0 = arith.constant 0 : i32
    %c0_i32_1 = arith.constant 0 : i32
    %c0_i32_2 = arith.constant 0 : i32
    return %c0_i32, %c0_i32_0, %c0_i32_1 : i32, i32, i32
  }
  func.func @transform_3(%arg0: i32) -> (i32, i32, i32) {
    %c0_i32 = arith.constant 0 : i32
    %c0_i32_0 = arith.constant 0 : i32
    %c0_i32_1 = arith.constant 0 : i32
    return %arg0, %c0_i32, %c0_i32_0 : i32, i32, i32
  }
  func.func @transform_4(%arg0: i32) -> (i32, i32, i32) {
    %c0_i32 = arith.constant 0 : i32
    %0 = arith.subi %c0_i32, %arg0 : i32
    %c0_i32_0 = arith.constant 0 : i32
    %c0_i32_1 = arith.constant 0 : i32
    %c0_i32_2 = arith.constant 0 : i32
    return %0, %c0_i32_0, %c0_i32_1 : i32, i32, i32
  }
}

</mosaic_0001>

<bundles_post_ra>
// kernel: _bilstm_forward_impl.2
= control target key start
LH: loop header
LB: loop body
LE: loop exit
PB: predicated region body
PF: predicated region fallthrough
CT: control target
= control target key end

     0   :  { %vm59_vm0 = vcmask 261120   ;;  %v2375_v0 = vmov 0.0|0.0   ;;  %v2376_v4 = vmov 0.0   ;;  %vm2377_vm1 = vmmov 0   ;;  %s2379_s9 = smov 64   ;;  %s2780_s2 = inlined_call_operand.vmem [shape: f32[2,32,128], index: 2, kind: input, shape index: {}]   ;;  %s2781_s0 = inlined_call_operand.vmem [shape: f32[2,8,8,128], index: 0, kind: input, shape index: {}, may-alias: {0,1}]   ;;  %s2782_s1 = inlined_call_operand.vmem [shape: f32[2,8,8,128], index: 1, kind: input, shape index: {}, may-alias: {0,1}]   ;;  %s2783_s3 = inlined_call_operand.vmem [shape: f32[8,8,32], index: 3, kind: output, shape index: {0}]   ;;  %s2784_s4 = inlined_call_operand.vmem [shape: f32[8,8,32], index: 4, kind: output, shape index: {1}]  }
   0x1   :  { %2145 = vmatprep.subr.bf16.mxu0 %v2375_v0  ;;  %v64_v1 = vld [vmem:[%s2780_s2] sm:$0xff]  ;;  %v65_v2 = vld [vmem:[%s2780_s2 + $0x8] sm:$0xff]  ;;  %2151 = vmatprep.subr.bf16.mxu1 %v2375_v0  ;;  %60 = vst.msk [vmem:[#allocation2] sm:$0xff] %vm59_vm0, %v2376_v4  ;;  %61 = vst.msk [vmem:[#allocation2 + $0x8] sm:$0xff] %vm59_vm0, %v2376_v4 }
   0x2   :  { %v1824_v3 = vld [vmem:[%s2780_s2 + $0x20] sm:$0xff]  ;;  %62 = vst.msk [vmem:[#allocation3] sm:$0xff] %vm59_vm0, %v2376_v4  ;;  %63 = vst.msk [vmem:[#allocation3 + $0x8] sm:$0xff] %vm59_vm0, %v2376_v4  ;;  %v2425_v5 = vpack.c.bf16 %v65_v2, %v64_v1  ;;  %v1825_v6 = vld [vmem:[%s2780_s2 + $0x28] sm:$0xff]  ;;  %1977 = vmatprep.mubr.msk.f32.mxu0 %vm2377_vm1, %v2376_v4  ;;  %1988 = vmatprep.mubr.msk.f32.mxu1 %vm2377_vm1, %v2376_v4 }
   0x3   :  { %v66_v7 = vld [vmem:[%s2780_s2 + $0x10] sm:$0xff]  ;;  %v67_v8 = vld [vmem:[%s2780_s2 + $0x18] sm:$0xff]  ;;  %v2440_v9 = vpack.c.bf16 %v1825_v6, %v1824_v3  ;;  %v79_v18 = vld [vmem:[%s2781_s0] sm:$0xff] }
   0x4   :  { %v1826_v10 = vld [vmem:[%s2780_s2 + $0x30] sm:$0xff]  ;;  %v1827_v11 = vld [vmem:[%s2780_s2 + $0x38] sm:$0xff]  ;;  %2147 = vmatpush3.bf16.msra.mxu0 %v2425_v5  ;;  %v2449_v12 = vpack.c.bf16 %v67_v8, %v66_v7  ;;  %s2378_s2 = smov 32   ;;  %v1834_v56 = vld [vmem:[%s2781_s0 + $0x8] sm:$0xff] }
   0x5   :  { %2148 = vmatprep.subr.bf16.mxu0 %v2375_v0  ;;  %2153 = vmatpush3.bf16.msra.mxu1 %v2440_v9  ;;  %v2453_v13 = vpack.c.bf16 %v1827_v11, %v1826_v10  ;;  %v1830_v19 = vld [vmem:[%s2782_s1 + $0x78] sm:$0xff]  ;;  %v1837_v60 = vld [vmem:[%s2782_s1 + $0x70] sm:$0xff] }
   0x6   :  { %2154 = vmatprep.subr.bf16.mxu1 %v2375_v0 }
   0x8   :  { %2150 = vmatpush3.bf16.msra.mxu0 %v2449_v12  ;;  %v73_v14 = vld [vmem:[#allocation2] sm:$0xff]  ;;  %v76_v16 = vld [vmem:[#allocation2 + $0x8] sm:$0xff] }
   0x9   :  { %v74_v15 = vld [vmem:[#allocation3] sm:$0xff]  ;;  %2156 = vmatpush3.bf16.msra.mxu1 %v2453_v13  ;;  %v78_v17 = vld [vmem:[#allocation3 + $0x8] sm:$0xff]  ;;  %2157 = vmatprep.subr.bf16.mxu0 %v2375_v0 }
   0xa   :  { %163 = vrot.lane.b32.xlu1 %v74_v15, %s2378_s2  ;;  %2163 = vmatprep.subr.bf16.mxu1 %v2375_v0 }
   0xb   :  { %1978 = vmatmul.mubr.msk.f32.vlgmr.msra.gmra.mrb[0].mxu0 %vm59_vm0, %v73_v14 }
   0xc   :  { %1989 = vmatmul.mubr.msk.f32.vlgmr.msra.gmra.mrb[0].mxu1 %vm59_vm0, %v76_v16  ;;  %2159 = vmatpush3.bf16.msra.mxu0 %v2425_v5 }
   0xd   :  { %2160 = vmatprep.subr.bf16.mxu0 %v2375_v0  ;;  %2165 = vmatpush3.bf16.msra.mxu1 %v2440_v9 }
   0xe   :  { %267 = vrot.lane.b32.xlu1 %v78_v17, %s2378_s2  ;;  %1999 = vmatprep.mubr.msk.f32.mxu0 %vm2377_vm1, %v2376_v4 }
   0xf   :  { %2166 = vmatprep.subr.bf16.mxu1 %v2375_v0  ;;  %2010 = vmatprep.mubr.msk.f32.mxu1 %vm2377_vm1, %v2376_v4 }
  0x10   :  { %2162 = vmatpush3.bf16.msra.mxu0 %v2449_v12 }
  0x11   :  { %2169 = vmatprep.subr.bf16.mxu0 %v2375_v0  ;;  %2168 = vmatpush3.bf16.msra.mxu1 %v2453_v13 }
  0x12   :  { %2175 = vmatprep.subr.bf16.mxu1 %v2375_v0 }
  0x7c   :  { %v164_v40 = vpop.permute.xlu1 %163 }
  0x80   :  { %v268_v42 = vpop.permute.xlu1 %267 }
  0xde   :  { %v150_v20 = vpop.f32.mrb[0].mxu0 }
  0xdf   :  { %v154_v21 = vadd.f32 %v150_v20, %v79_v18  ;;  %v1979_v22 = vpop.f32.mrb[1].mxu0  ;;  %v254_v23 = vpop.f32.mrb[0].mxu1 }
  0xe0   :  { %v258_v24 = vadd.f32 %v1830_v19, %v254_v23  ;;  %v1990_v25 = vpop.f32.mrb[1].mxu1 }
  0xe1   :  { %2247 = vtanh.f32 %v154_v21  ;;  %v1829_v28 = vmul.f32 -1.442695, %v154_v21 }
  0xe2   :  { %2249 = vtanh.f32 %v258_v24  ;;  %v1832_v29 = vmul.f32 -1.442695, %v258_v24 }
  0xe3   :  { %2251 = vpow2.f32 %v1829_v28 }
  0xe4   :  { %2253 = vpow2.f32 %v1832_v29 }
  0xeb   :  { %v2248_v26 = vpop.eup %2247 }
  0xec   :  { %168 = vrot.lane.b32.xlu0 %v2248_v26, %s2379_s9  ;;  %v2250_v27 = vpop.eup %2249 }
  0xed   :  { %v2252_v30 = vpop.eup %2251 }
  0xee   :  { %v158_v31 = vadd.f32 1.0, %v2252_v30  ;;  %v2254_v32 = vpop.eup %2253 }
  0xef   :  { %v262_v33 = vadd.f32 1.0, %v2254_v32 }
  0xf0   :  { %272 = vrot.lane.b32.xlu0 %v2250_v27, %s2379_s9  ;;  %2255 = vrcp.f32 %v158_v31 }
  0xf1   :  { %2257 = vrcp.f32 %v262_v33 }
  0xfa   :  { %v2256_v34 = vpop.eup %2255 }
  0xfb   :  { %v2258_v37 = vpop.eup %2257  ;;  %v166_v41 = vmul.f32 %v2256_v34, %v164_v40 }
  0xfc   :  { %v270_v45 = vmul.f32 %v2258_v37, %v268_v42 }
 0x15e   :  { %v169_v35 = vpop.permute.xlu0 %168 }
 0x15f   :  { %v171_v36 = vmul.f32 %v2256_v34, %v169_v35 }
 0x161   :  { %173 = vrot.lane.b32.xlu0 %v171_v36, %s2378_s2 }
 0x162   :  { %v273_v38 = vpop.permute.xlu0 %272 }
 0x163   :  { %v275_v39 = vmul.f32 %v2258_v37, %v273_v38  ;;  %v1845_v38 = vld [vmem:[%s2782_s1 + $0x68] sm:$0xff] }
 0x165   :  { %277 = vrot.lane.b32.xlu1 %v275_v39, %s2378_s2 }
 0x1d3   :  { %v174_v43 = vpop.permute.xlu0 %173 }
 0x1d4   :  { %v2486_v44 = vadd.f32 %v174_v43, %v166_v41 }
 0x1d6   :  { %2259 = vtanh.f32 %v2486_v44 }
 0x1d7   :  { %v278_v46 = vpop.permute.xlu1 %277 }
 0x1d8   :  { %v2489_v47 = vadd.f32 %v278_v46, %v270_v45 }
 0x1da   :  { %2261 = vtanh.f32 %v2489_v47 }
 0x1e0   :  { %v2260_v48 = vpop.eup %2259 }
 0x1e1   :  { %179 = vrot.lane.b32.xlu0 %v2260_v48, %s2379_s9 }
 0x1e4   :  { %v2262_v49 = vpop.eup %2261 }
 0x1e5   :  { %283 = vrot.lane.b32.xlu1 %v2262_v49, %s2379_s9 }
 0x253   :  { %v180_v50 = vpop.permute.xlu0 %179 }
 0x254   :  { %v182_v51 = vmul.f32 %v2256_v34, %v180_v50  ;;  %v1842_v34 = vld [vmem:[%s2781_s0 + $0x10] sm:$0xff] }
 0x256   :  { %288 = vrot.lane.b32.xlu0 %v182_v51, %s2378_s2 }
 0x257   :  { %v284_v52 = vpop.permute.xlu1 %283 }
 0x258   :  { %v286_v53 = vmul.f32 %v2258_v37, %v284_v52 }
 0x25a   :  { %293 = vrot.lane.b32.xlu1 %v286_v53, %s2378_s2 }
 0x2c8   :  { %v289_v54 = vpop.permute.xlu0 %288 }
 0x2c9   :  { %291 = vst.msk [vmem:[%s2783_s3] sm:$0xff] %vm59_vm0, %v289_v54  ;;  %2000 = vmatmul.mubr.msk.f32.vlgmr.msra.gmra.mrb[2].mxu0 %vm59_vm0, %v289_v54 }
 0x2ca   :  { %2171 = vmatpush3.bf16.msra.mxu0 %v2425_v5  ;;  %2021 = vmatprep.mubr.msk.f32.mxu0 %vm2377_vm1, %v2376_v4 }
 0x2cb   :  { %2172 = vmatprep.subr.bf16.mxu0 %v2375_v0 }
 0x2cc   :  { %v294_v55 = vpop.permute.xlu1 %293 }
 0x2cd   :  { %1833 = vst.msk [vmem:[%s2784_s4 + $0x38] sm:$0xff] %vm59_vm0, %v294_v55  ;;  %2011 = vmatmul.mubr.msk.f32.vlgmr.msra.gmra.mrb[2].mxu1 %vm59_vm0, %v294_v55 }
 0x2ce   :  { %2174 = vmatpush3.bf16.msra.mxu0 %v2449_v12  ;;  %2177 = vmatpush3.bf16.msra.mxu1 %v2440_v9 }
 0x2cf   :  { %2178 = vmatprep.subr.bf16.mxu1 %v2375_v0  ;;  %2032 = vmatprep.mubr.msk.f32.mxu1 %vm2377_vm1, %v2376_v4 }
 0x2d0   :  { %2181 = vmatprep.subr.bf16.mxu0 %v2375_v0 }
 0x2d2   :  { %2180 = vmatpush3.bf16.msra.mxu1 %v2453_v13 }
 0x2d3   :  { %2187 = vmatprep.subr.bf16.mxu1 %v2375_v0 }
 0x39c   :  { %v368_v57 = vpop.f32.mrb[2].mxu0 }
 0x39d   :  { %v372_v58 = vadd.f32 %v1834_v56, %v368_v57  ;;  %v2001_v59 = vpop.f32.mrb[3].mxu0 }
 0x39f   :  { %2263 = vtanh.f32 %v372_v58  ;;  %v1836_v3 = vmul.f32 -1.442695, %v372_v58 }
 0x3a0   :  { %v467_v61 = vpop.f32.mrb[2].mxu1 }
 0x3a1   :  { %v471_v62 = vadd.f32 %v1837_v60, %v467_v61  ;;  %v2012_v63 = vpop.f32.mrb[3].mxu1 }
 0x3a3   :  { %2265 = vtanh.f32 %v471_v62  ;;  %v1839_v6 = vmul.f32 -1.442695, %v471_v62 }
 0x3a4   :  { %2267 = vpow2.f32 %v1836_v3 }
 0x3a5   :  { %2269 = vpow2.f32 %v1839_v6 }
 0x3a9   :  { %v2264_v1 = vpop.eup %2263 }
 0x3aa   :  { %382 = vrot.lane.b32.xlu0 %v2264_v1, %s2379_s9 }
 0x3ad   :  { %v2266_v2 = vpop.eup %2265 }
 0x3ae   :  { %481 = vrot.lane.b32.xlu1 %v2266_v2, %s2379_s9  ;;  %v2268_v7 = vpop.eup %2267 }
 0x3af   :  { %v376_v8 = vadd.f32 1.0, %v2268_v7  ;;  %v2270_v10 = vpop.eup %2269 }
 0x3b0   :  { %v475_v11 = vadd.f32 1.0, %v2270_v10  ;;  %v1850_v10 = vld [vmem:[%s2781_s0 + $0x18] sm:$0xff] }
 0x3b1   :  { %2271 = vrcp.f32 %v376_v8 }
 0x3b2   :  { %2273 = vrcp.f32 %v475_v11 }
 0x3bb   :  { %v2272_v14 = vpop.eup %2271 }
 0x3bc   :  { %v2274_v17 = vpop.eup %2273  ;;  %v380_v20 = vmul.f32 %v2272_v14, %v2486_v44 }
 0x3bd   :  { %v479_v23 = vmul.f32 %v2274_v17, %v2489_v47 }
 0x41c   :  { %v383_v15 = vpop.permute.xlu0 %382 }
 0x41d   :  { %v385_v16 = vmul.f32 %v2272_v14, %v383_v15 }
 0x41f   :  { %387 = vrot.lane.b32.xlu0 %v385_v16, %s2378_s2  ;;  %v1853_v16 = vld [vmem:[%s2782_s1 + $0x60] sm:$0xff] }
 0x420   :  { %v482_v18 = vpop.permute.xlu1 %481 }
 0x421   :  { %v484_v19 = vmul.f32 %v2274_v17, %v482_v18 }
 0x423   :  { %486 = vrot.lane.b32.xlu1 %v484_v19, %s2378_s2 }
 0x491   :  { %v388_v21 = vpop.permute.xlu0 %387 }
 0x492   :  { %v2529_v22 = vadd.f32 %v388_v21, %v380_v20 }
 0x494   :  { %2275 = vtanh.f32 %v2529_v22 }
 0x495   :  { %v487_v24 = vpop.permute.xlu1 %486 }
 0x496   :  { %v2533_v25 = vadd.f32 %v487_v24, %v479_v23 }
 0x498   :  { %2277 = vtanh.f32 %v2533_v25 }
 0x49e   :  { %v2276_v26 = vpop.eup %2275 }
 0x49f   :  { %393 = vrot.lane.b32.xlu0 %v2276_v26, %s2379_s9 }
 0x4a2   :  { %v2278_v27 = vpop.eup %2277 }
 0x4a3   :  { %492 = vrot.lane.b32.xlu1 %v2278_v27, %s2379_s9 }
 0x511   :  { %v394_v28 = vpop.permute.xlu0 %393 }
 0x512   :  { %v396_v29 = vmul.f32 %v2272_v14, %v394_v28 }
 0x514   :  { %497 = vrot.lane.b32.xlu0 %v396_v29, %s2378_s2 }
 0x515   :  { %v493_v30 = vpop.permute.xlu1 %492 }
 0x516   :  { %v495_v31 = vmul.f32 %v2274_v17, %v493_v30 }
 0x518   :  { %503 = vrot.lane.b32.xlu1 %v495_v31, %s2378_s2 }
 0x586   :  { %v498_v32 = vpop.permute.xlu0 %497 }
 0x587   :  { %1840 = vst.msk [vmem:[%s2783_s3 + $0x8] sm:$0xff] %vm59_vm0, %v498_v32  ;;  %2022 = vmatmul.mubr.msk.f32.vlgmr.msra.gmra.mrb[4].mxu0 %vm59_vm0, %v498_v32 }
 0x588   :  { %2183 = vmatpush3.bf16.msra.mxu0 %v2425_v5  ;;  %2043 = vmatprep.mubr.msk.f32.mxu0 %vm2377_vm1, %v2376_v4 }
 0x589   :  { %2184 = vmatprep.subr.bf16.mxu0 %v2375_v0 }
 0x58a   :  { %v504_v33 = vpop.permute.xlu1 %503 }
 0x58b   :  { %1841 = vst.msk [vmem:[%s2784_s4 + $0x30] sm:$0xff] %vm59_vm0, %v504_v33  ;;  %2033 = vmatmul.mubr.msk.f32.vlgmr.msra.gmra.mrb[4].mxu1 %vm59_vm0, %v504_v33 }
 0x58c   :  { %2186 = vmatpush3.bf16.msra.mxu0 %v2449_v12  ;;  %2189 = vmatpush3.bf16.msra.mxu1 %v2440_v9 }
 0x58d   :  { %2190 = vmatprep.subr.bf16.mxu1 %v2375_v0  ;;  %2054 = vmatprep.mubr.msk.f32.mxu1 %vm2377_vm1, %v2376_v4 }
 0x58e   :  { %2193 = vmatprep.subr.bf16.mxu0 %v2375_v0 }
 0x590   :  { %2192 = vmatpush3.bf16.msra.mxu1 %v2453_v13 }
 0x591   :  { %2199 = vmatprep.subr.bf16.mxu1 %v2375_v0 }
 0x65a   :  { %v578_v35 = vpop.f32.mrb[4].mxu0 }
 0x65b   :  { %v582_v36 = vadd.f32 %v1842_v34, %v578_v35  ;;  %v2023_v37 = vpop.f32.mrb[5].mxu0 }
 0x65d   :  { %2279 = vtanh.f32 %v582_v36  ;;  %v1844_v44 = vmul.f32 -1.442695, %v582_v36 }
 0x65e   :  { %v677_v39 = vpop.f32.mrb[4].mxu1 }
 0x65f   :  { %v681_v40 = vadd.f32 %v1845_v38, %v677_v39  ;;  %v2034_v41 = vpop.f32.mrb[5].mxu1 }
 0x661   :  { %2281 = vtanh.f32 %v681_v40  ;;  %v1847_v45 = vmul.f32 -1.442695, %v681_v40 }
 0x662   :  { %2283 = vpow2.f32 %v1844_v44 }
 0x663   :  { %2285 = vpow2.f32 %v1847_v45 }
 0x667   :  { %v2280_v42 = vpop.eup %2279 }
 0x668   :  { %592 = vrot.lane.b32.xlu0 %v2280_v42, %s2379_s9 }
 0x66b   :  { %v2282_v43 = vpop.eup %2281 }
 0x66c   :  { %691 = vrot.lane.b32.xlu1 %v2282_v43, %s2379_s9  ;;  %v2284_v46 = vpop.eup %2283 }
 0x66d   :  { %v586_v47 = vadd.f32 1.0, %v2284_v46  ;;  %v2286_v48 = vpop.eup %2285 }
 0x66e   :  { %v685_v49 = vadd.f32 1.0, %v2286_v48  ;;  %v1858_v48 = vld [vmem:[%s2781_s0 + $0x20] sm:$0xff] }
 0x66f   :  { %2287 = vrcp.f32 %v586_v47 }
 0x670   :  { %2289 = vrcp.f32 %v685_v49 }
 0x679   :  { %v2288_v50 = vpop.eup %2287 }
 0x67a   :  { %v2290_v53 = vpop.eup %2289  ;;  %v590_v56 = vmul.f32 %v2288_v50, %v2529_v22 }
 0x67b   :  { %v689_v59 = vmul.f32 %v2290_v53, %v2533_v25 }
 0x6da   :  { %v593_v51 = vpop.permute.xlu0 %592 }
 0x6db   :  { %v595_v52 = vmul.f32 %v2288_v50, %v593_v51 }
 0x6dd   :  { %597 = vrot.lane.b32.xlu0 %v595_v52, %s2378_s2  ;;  %v1861_v52 = vld [vmem:[%s2782_s1 + $0x58] sm:$0xff] }
 0x6de   :  { %v692_v54 = vpop.permute.xlu1 %691 }
 0x6df   :  { %v694_v55 = vmul.f32 %v2290_v53, %v692_v54 }
 0x6e1   :  { %696 = vrot.lane.b32.xlu1 %v694_v55, %s2378_s2 }
 0x74f   :  { %v598_v57 = vpop.permute.xlu0 %597 }
 0x750   :  { %v2573_v58 = vadd.f32 %v598_v57, %v590_v56 }
 0x752   :  { %2291 = vtanh.f32 %v2573_v58 }
 0x753   :  { %v697_v60 = vpop.permute.xlu1 %696 }
 0x754   :  { %v2577_v61 = vadd.f32 %v697_v60, %v689_v59 }
 0x756   :  { %2293 = vtanh.f32 %v2577_v61 }
 0x75c   :  { %v2292_v62 = vpop.eup %2291 }
 0x75d   :  { %603 = vrot.lane.b32.xlu0 %v2292_v62, %s2379_s9 }
 0x760   :  { %v2294_v63 = vpop.eup %2293 }
 0x761   :  { %702 = vrot.lane.b32.xlu1 %v2294_v63, %s2379_s9 }
 0x7cf   :  { %v604_v1 = vpop.permute.xlu0 %603 }
 0x7d0   :  { %v606_v2 = vmul.f32 %v2288_v50, %v604_v1 }
 0x7d2   :  { %707 = vrot.lane.b32.xlu0 %v606_v2, %s2378_s2 }
 0x7d3   :  { %v703_v3 = vpop.permute.xlu1 %702 }
 0x7d4   :  { %v705_v6 = vmul.f32 %v2290_v53, %v703_v3 }
 0x7d6   :  { %713 = vrot.lane.b32.xlu1 %v705_v6, %s2378_s2 }
 0x844   :  { %v708_v7 = vpop.permute.xlu0 %707 }
 0x845   :  { %1848 = vst.msk [vmem:[%s2783_s3 + $0x10] sm:$0xff] %vm59_vm0, %v708_v7  ;;  %2044 = vmatmul.mubr.msk.f32.vlgmr.msra.gmra.mrb[6].mxu0 %vm59_vm0, %v708_v7 }
 0x846   :  { %2195 = vmatpush3.bf16.msra.mxu0 %v2425_v5  ;;  %2065 = vmatprep.mubr.msk.f32.mxu0 %vm2377_vm1, %v2376_v4 }
 0x847   :  { %2196 = vmatprep.subr.bf16.mxu0 %v2375_v0 }
 0x848   :  { %v714_v8 = vpop.permute.xlu1 %713 }
 0x849   :  { %1849 = vst.msk [vmem:[%s2784_s4 + $0x28] sm:$0xff] %vm59_vm0, %v714_v8  ;;  %2055 = vmatmul.mubr.msk.f32.vlgmr.msra.gmra.mrb[6].mxu1 %vm59_vm0, %v714_v8 }
 0x84a   :  { %2198 = vmatpush3.bf16.msra.mxu0 %v2449_v12  ;;  %2201 = vmatpush3.bf16.msra.mxu1 %v2440_v9 }
 0x84b   :  { %2202 = vmatprep.subr.bf16.mxu1 %v2375_v0  ;;  %2076 = vmatprep.mubr.msk.f32.mxu1 %vm2377_vm1, %v2376_v4 }
 0x84c   :  { %2205 = vmatprep.subr.bf16.mxu0 %v2375_v0 }
 0x84e   :  { %2204 = vmatpush3.bf16.msra.mxu1 %v2453_v13 }
 0x84f   :  { %2211 = vmatprep.subr.bf16.mxu1 %v2375_v0 }
 0x918   :  { %v788_v11 = vpop.f32.mrb[6].mxu0 }
 0x919   :  { %v792_v14 = vadd.f32 %v1850_v10, %v788_v11  ;;  %v2045_v15 = vpop.f32.mrb[7].mxu0 }
 0x91b   :  { %2295 = vtanh.f32 %v792_v14  ;;  %v1852_v22 = vmul.f32 -1.442695, %v792_v14 }
 0x91c   :  { %v887_v17 = vpop.f32.mrb[6].mxu1 }
 0x91d   :  { %v891_v18 = vadd.f32 %v1853_v16, %v887_v17  ;;  %v2056_v19 = vpop.f32.mrb[7].mxu1 }
 0x91f   :  { %2297 = vtanh.f32 %v891_v18  ;;  %v1855_v23 = vmul.f32 -1.442695, %v891_v18 }
 0x920   :  { %2299 = vpow2.f32 %v1852_v22 }
 0x921   :  { %2301 = vpow2.f32 %v1855_v23 }
 0x925   :  { %v2296_v20 = vpop.eup %2295 }
 0x926   :  { %802 = vrot.lane.b32.xlu0 %v2296_v20, %s2379_s9 }
 0x929   :  { %v2298_v21 = vpop.eup %2297 }
 0x92a   :  { %901 = vrot.lane.b32.xlu1 %v2298_v21, %s2379_s9  ;;  %v2300_v24 = vpop.eup %2299 }
 0x92b   :  { %v796_v25 = vadd.f32 1.0, %v2300_v24  ;;  %v2302_v26 = vpop.eup %2301 }
 0x92c   :  { %v895_v27 = vadd.f32 1.0, %v2302_v26  ;;  %v1866_v26 = vld [vmem:[%s2781_s0 + $0x28] sm:$0xff] }
 0x92d   :  { %2303 = vrcp.f32 %v796_v25 }
 0x92e   :  { %2305 = vrcp.f32 %v895_v27 }
 0x937   :  { %v2304_v28 = vpop.eup %2303 }
 0x938   :  { %v2306_v31 = vpop.eup %2305  ;;  %v800_v34 = vmul.f32 %v2304_v28, %v2573_v58 }
 0x939   :  { %v899_v37 = vmul.f32 %v2306_v31, %v2577_v61 }
 0x998   :  { %v803_v29 = vpop.permute.xlu0 %802 }
 0x999   :  { %v805_v30 = vmul.f32 %v2304_v28, %v803_v29 }
 0x99b   :  { %807 = vrot.lane.b32.xlu0 %v805_v30, %s2378_s2  ;;  %v1869_v30 = vld [vmem:[%s2782_s1 + $0x50] sm:$0xff] }
 0x99c   :  { %v902_v32 = vpop.permute.xlu1 %901 }
 0x99d   :  { %v904_v33 = vmul.f32 %v2306_v31, %v902_v32 }
 0x99f   :  { %906 = vrot.lane.b32.xlu1 %v904_v33, %s2378_s2 }
 0xa0d   :  { %v808_v35 = vpop.permute.xlu0 %807 }
 0xa0e   :  { %v2617_v36 = vadd.f32 %v808_v35, %v800_v34 }
 0xa10   :  { %2307 = vtanh.f32 %v2617_v36 }
 0xa11   :  { %v907_v38 = vpop.permute.xlu1 %906 }
 0xa12   :  { %v2621_v39 = vadd.f32 %v907_v38, %v899_v37 }
 0xa14   :  { %2309 = vtanh.f32 %v2621_v39 }
 0xa1a   :  { %v2308_v40 = vpop.eup %2307 }
 0xa1b   :  { %813 = vrot.lane.b32.xlu0 %v2308_v40, %s2379_s9 }
 0xa1e   :  { %v2310_v41 = vpop.eup %2309 }
 0xa1f   :  { %912 = vrot.lane.b32.xlu1 %v2310_v41, %s2379_s9 }
 0xa8d   :  { %v814_v42 = vpop.permute.xlu0 %813 }
 0xa8e   :  { %v816_v43 = vmul.f32 %v2304_v28, %v814_v42 }
 0xa90   :  { %917 = vrot.lane.b32.xlu0 %v816_v43, %s2378_s2 }
 0xa91   :  { %v913_v44 = vpop.permute.xlu1 %912 }
 0xa92   :  { %v915_v45 = vmul.f32 %v2306_v31, %v913_v44 }
 0xa94   :  { %923 = vrot.lane.b32.xlu1 %v915_v45, %s2378_s2 }
 0xb02   :  { %v918_v46 = vpop.permute.xlu0 %917 }
 0xb03   :  { %1856 = vst.msk [vmem:[%s2783_s3 + $0x18] sm:$0xff] %vm59_vm0, %v918_v46  ;;  %2066 = vmatmul.mubr.msk.f32.vlgmr.msra.gmra.mrb[8].mxu0 %vm59_vm0, %v918_v46 }
 0xb04   :  { %2207 = vmatpush3.bf16.msra.mxu0 %v2425_v5  ;;  %2087 = vmatprep.mubr.msk.f32.mxu0 %vm2377_vm1, %v2376_v4 }
 0xb05   :  { %2208 = vmatprep.subr.bf16.mxu0 %v2375_v0 }
 0xb06   :  { %v924_v47 = vpop.permute.xlu1 %923 }
 0xb07   :  { %1857 = vst.msk [vmem:[%s2784_s4 + $0x20] sm:$0xff] %vm59_vm0, %v924_v47  ;;  %2077 = vmatmul.mubr.msk.f32.vlgmr.msra.gmra.mrb[8].mxu1 %vm59_vm0, %v924_v47 }
 0xb08   :  { %2210 = vmatpush3.bf16.msra.mxu0 %v2449_v12  ;;  %2213 = vmatpush3.bf16.msra.mxu1 %v2440_v9 }
 0xb09   :  { %2214 = vmatprep.subr.bf16.mxu1 %v2375_v0  ;;  %2098 = vmatprep.mubr.msk.f32.mxu1 %vm2377_vm1, %v2376_v4 }
 0xb0a   :  { %2217 = vmatprep.subr.bf16.mxu0 %v2375_v0 }
 0xb0c   :  { %2216 = vmatpush3.bf16.msra.mxu1 %v2453_v13 }
 0xb0d   :  { %2223 = vmatprep.subr.bf16.mxu1 %v2375_v0 }
 0xbd6   :  { %v998_v49 = vpop.f32.mrb[8].mxu0 }
 0xbd7   :  { %v1002_v50 = vadd.f32 %v1858_v48, %v998_v49  ;;  %v2067_v51 = vpop.f32.mrb[9].mxu0 }
 0xbd9   :  { %2311 = vtanh.f32 %v1002_v50  ;;  %v1860_v58 = vmul.f32 -1.442695, %v1002_v50 }
 0xbda   :  { %v1097_v53 = vpop.f32.mrb[8].mxu1 }
 0xbdb   :  { %v1101_v54 = vadd.f32 %v1861_v52, %v1097_v53  ;;  %v2078_v55 = vpop.f32.mrb[9].mxu1 }
 0xbdd   :  { %2313 = vtanh.f32 %v1101_v54  ;;  %v1863_v59 = vmul.f32 -1.442695, %v1101_v54 }
 0xbde   :  { %2315 = vpow2.f32 %v1860_v58 }
 0xbdf   :  { %2317 = vpow2.f32 %v1863_v59 }
 0xbe3   :  { %v2312_v56 = vpop.eup %2311 }
 0xbe4   :  { %1012 = vrot.lane.b32.xlu0 %v2312_v56, %s2379_s9 }
 0xbe7   :  { %v2314_v57 = vpop.eup %2313 }
 0xbe8   :  { %1111 = vrot.lane.b32.xlu1 %v2314_v57, %s2379_s9  ;;  %v2316_v60 = vpop.eup %2315 }
 0xbe9   :  { %v1006_v61 = vadd.f32 1.0, %v2316_v60  ;;  %v2318_v62 = vpop.eup %2317 }
 0xbea   :  { %v1105_v63 = vadd.f32 1.0, %v2318_v62 }
 0xbeb   :  { %2319 = vrcp.f32 %v1006_v61 }
 0xbec   :  { %2321 = vrcp.f32 %v1105_v63 }
 0xbf5   :  { %v2320_v1 = vpop.eup %2319 }
 0xbf6   :  { %v2322_v6 = vpop.eup %2321  ;;  %v1010_v10 = vmul.f32 %v2320_v1, %v2617_v36 }
 0xbf7   :  { %v1109_v15 = vmul.f32 %v2322_v6, %v2621_v39 }
 0xc56   :  { %v1013_v2 = vpop.permute.xlu0 %1012 }
 0xc57   :  { %v1015_v3 = vmul.f32 %v2320_v1, %v1013_v2 }
 0xc59   :  { %1017 = vrot.lane.b32.xlu0 %v1015_v3, %s2378_s2 }
 0xc5a   :  { %v1112_v7 = vpop.permute.xlu1 %1111 }
 0xc5b   :  { %v1114_v8 = vmul.f32 %v2322_v6, %v1112_v7 }
 0xc5d   :  { %1116 = vrot.lane.b32.xlu1 %v1114_v8, %s2378_s2 }
 0xccb   :  { %v1018_v11 = vpop.permute.xlu0 %1017 }
 0xccc   :  { %v2661_v14 = vadd.f32 %v1018_v11, %v1010_v10 }
 0xcce   :  { %2323 = vtanh.f32 %v2661_v14 }
 0xccf   :  { %v1117_v16 = vpop.permute.xlu1 %1116 }
 0xcd0   :  { %v2665_v17 = vadd.f32 %v1117_v16, %v1109_v15 }
 0xcd2   :  { %2325 = vtanh.f32 %v2665_v17 }
 0xcd8   :  { %v2324_v18 = vpop.eup %2323 }
 0xcd9   :  { %1023 = vrot.lane.b32.xlu0 %v2324_v18, %s2379_s9 }
 0xcdc   :  { %v2326_v19 = vpop.eup %2325 }
 0xcdd   :  { %1122 = vrot.lane.b32.xlu1 %v2326_v19, %s2379_s9 }
 0xd4b   :  { %v1024_v20 = vpop.permute.xlu0 %1023 }
 0xd4c   :  { %v1026_v21 = vmul.f32 %v2320_v1, %v1024_v20 }
 0xd4e   :  { %1127 = vrot.lane.b32.xlu0 %v1026_v21, %s2378_s2 }
 0xd4f   :  { %v1123_v22 = vpop.permute.xlu1 %1122 }
 0xd50   :  { %v1125_v23 = vmul.f32 %v2322_v6, %v1123_v22 }
 0xd52   :  { %1133 = vrot.lane.b32.xlu1 %v1125_v23, %s2378_s2 }
 0xdc0   :  { %v1128_v24 = vpop.permute.xlu0 %1127 }
 0xdc1   :  { %1864 = vst.msk [vmem:[%s2783_s3 + $0x20] sm:$0xff] %vm59_vm0, %v1128_v24  ;;  %2088 = vmatmul.mubr.msk.f32.vlgmr.msra.gmra.mrb[10].mxu0 %vm59_vm0, %v1128_v24 }
 0xdc2   :  { %2219 = vmatpush3.bf16.msra.mxu0 %v2425_v5  ;;  %2109 = vmatprep.mubr.msk.f32.mxu0 %vm2377_vm1, %v2376_v4 }
 0xdc3   :  { %2220 = vmatprep.subr.bf16.mxu0 %v2375_v0 }
 0xdc4   :  { %v1134_v25 = vpop.permute.xlu1 %1133 }
 0xdc5   :  { %1865 = vst.msk [vmem:[%s2784_s4 + $0x18] sm:$0xff] %vm59_vm0, %v1134_v25  ;;  %2099 = vmatmul.mubr.msk.f32.vlgmr.msra.gmra.mrb[10].mxu1 %vm59_vm0, %v1134_v25 }
 0xdc6   :  { %2222 = vmatpush3.bf16.msra.mxu0 %v2449_v12  ;;  %2225 = vmatpush3.bf16.msra.mxu1 %v2440_v9 }
 0xdc7   :  { %2226 = vmatprep.subr.bf16.mxu1 %v2375_v0  ;;  %2120 = vmatprep.mubr.msk.f32.mxu1 %vm2377_vm1, %v2376_v4 }
 0xdc8   :  { %2229 = vmatprep.subr.bf16.mxu0 %v2375_v0 }
 0xdca   :  { %2228 = vmatpush3.bf16.msra.mxu1 %v2453_v13 }
 0xdcb   :  { %2235 = vmatprep.subr.bf16.mxu1 %v2375_v0 }
 0xe94   :  { %v1208_v27 = vpop.f32.mrb[10].mxu0 }
 0xe95   :  { %v1212_v28 = vadd.f32 %v1866_v26, %v1208_v27  ;;  %v2089_v29 = vpop.f32.mrb[11].mxu0 }
 0xe97   :  { %2327 = vtanh.f32 %v1212_v28  ;;  %v1868_v36 = vmul.f32 -1.442695, %v1212_v28 }
 0xe98   :  { %v1307_v31 = vpop.f32.mrb[10].mxu1 }
 0xe99   :  { %v1311_v32 = vadd.f32 %v1869_v30, %v1307_v31  ;;  %v2100_v33 = vpop.f32.mrb[11].mxu1 }
 0xe9b   :  { %2329 = vtanh.f32 %v1311_v32  ;;  %v1871_v37 = vmul.f32 -1.442695, %v1311_v32 }
 0xe9c   :  { %2331 = vpow2.f32 %v1868_v36 }
 0xe9d   :  { %2333 = vpow2.f32 %v1871_v37 }
 0xea1   :  { %v2328_v34 = vpop.eup %2327 }
 0xea2   :  { %1222 = vrot.lane.b32.xlu0 %v2328_v34, %s2379_s9  ;;  %v1882_v34 = vld [vmem:[%s2781_s0 + $0x38] sm:$0xff] }
 0xea5   :  { %v2330_v35 = vpop.eup %2329 }
 0xea6   :  { %1321 = vrot.lane.b32.xlu1 %v2330_v35, %s2379_s9  ;;  %v2332_v38 = vpop.eup %2331 }
 0xea7   :  { %v1216_v39 = vadd.f32 1.0, %v2332_v38  ;;  %v2334_v40 = vpop.eup %2333  ;;  %v1885_v38 = vld [vmem:[%s2782_s1 + $0x40] sm:$0xff] }
 0xea8   :  { %v1315_v41 = vadd.f32 1.0, %v2334_v40 }
 0xea9   :  { %2335 = vrcp.f32 %v1216_v39 }
 0xeaa   :  { %2337 = vrcp.f32 %v1315_v41 }
 0xeb3   :  { %v2336_v42 = vpop.eup %2335 }
 0xeb4   :  { %v2338_v45 = vpop.eup %2337  ;;  %v1220_v48 = vmul.f32 %v2336_v42, %v2661_v14 }
 0xeb5   :  { %v1319_v51 = vmul.f32 %v2338_v45, %v2665_v17 }
 0xf14   :  { %v1223_v43 = vpop.permute.xlu0 %1222 }
 0xf15   :  { %v1225_v44 = vmul.f32 %v2336_v42, %v1223_v43 }
 0xf17   :  { %1227 = vrot.lane.b32.xlu0 %v1225_v44, %s2378_s2 }
 0xf18   :  { %v1322_v46 = vpop.permute.xlu1 %1321 }
 0xf19   :  { %v1324_v47 = vmul.f32 %v2338_v45, %v1322_v46 }
 0xf1b   :  { %1326 = vrot.lane.b32.xlu1 %v1324_v47, %s2378_s2 }
 0xf89   :  { %v1228_v49 = vpop.permute.xlu0 %1227 }
 0xf8a   :  { %v1230_v50 = vadd.f32 %v1228_v49, %v1220_v48 }
 0xf8c   :  { %2339 = vtanh.f32 %v1230_v50 }
 0xf8d   :  { %v1327_v52 = vpop.permute.xlu1 %1326 }
 0xf8e   :  { %v1329_v53 = vadd.f32 %v1327_v52, %v1319_v51 }
 0xf90   :  { %2341 = vtanh.f32 %v1329_v53 }
 0xf96   :  { %v2340_v54 = vpop.eup %2339 }
 0xf97   :  { %1233 = vrot.lane.b32.xlu0 %v2340_v54, %s2379_s9 }
 0xf9a   :  { %v2342_v55 = vpop.eup %2341 }
 0xf9b   :  { %1332 = vrot.lane.b32.xlu1 %v2342_v55, %s2379_s9 }
0x1009   :  { %v1234_v56 = vpop.permute.xlu0 %1233 }
0x100a   :  { %v1236_v57 = vmul.f32 %v2336_v42, %v1234_v56 }
0x100c   :  { %1337 = vrot.lane.b32.xlu0 %v1236_v57, %s2378_s2 }
0x100d   :  { %v1333_v58 = vpop.permute.xlu1 %1332 }
0x100e   :  { %v1335_v59 = vmul.f32 %v2338_v45, %v1333_v58 }
0x1010   :  { %1343 = vrot.lane.b32.xlu1 %v1335_v59, %s2378_s2 }
0x107e   :  { %v1338_v60 = vpop.permute.xlu0 %1337 }
0x107f   :  { %1872 = vst.msk [vmem:[%s2783_s3 + $0x28] sm:$0xff] %vm59_vm0, %v1338_v60  ;;  %2110 = vmatmul.mubr.msk.f32.vlgmr.msra.gmra.mrb[12].mxu0 %vm59_vm0, %v1338_v60 }
0x1080   :  { %2231 = vmatpush3.bf16.msra.mxu0 %v2425_v5  ;;  %2131 = vmatprep.mubr.msk.f32.mxu0 %vm2377_vm1, %v2376_v4  ;;  %v1874_v5 = vld [vmem:[%s2781_s0 + $0x30] sm:$0xff]  ;;  %s2380_s0 = smov 96  }
0x1081   :  { %2232 = vmatprep.subr.bf16.mxu0 %v2375_v0 }
0x1082   :  { %v1344_v61 = vpop.permute.xlu1 %1343 }
0x1083   :  { %1873 = vst.msk [vmem:[%s2784_s4 + $0x10] sm:$0xff] %vm59_vm0, %v1344_v61  ;;  %2121 = vmatmul.mubr.msk.f32.vlgmr.msra.gmra.mrb[12].mxu1 %vm59_vm0, %v1344_v61 }
0x1084   :  { %2234 = vmatpush3.bf16.msra.mxu0 %v2449_v12  ;;  %2237 = vmatpush3.bf16.msra.mxu1 %v2440_v9  ;;  %v1877_v12 = vld [vmem:[%s2782_s1 + $0x48] sm:$0xff] }
0x1085   :  { %2238 = vmatprep.subr.bf16.mxu1 %v2375_v0  ;;  %2142 = vmatprep.mubr.msk.f32.mxu1 %vm2377_vm1, %v2376_v4 }
0x1088   :  { %2240 = vmatpush3.bf16.msra.mxu1 %v2453_v13 }
0x1152   :  { %v1418_v62 = vpop.f32.mrb[12].mxu0 }
0x1153   :  { %v1422_v63 = vadd.f32 %v1874_v5, %v1418_v62  ;;  %v2111_v1 = vpop.f32.mrb[13].mxu0 }
0x1155   :  { %2343 = vtanh.f32 %v1422_v63  ;;  %v1876_v13 = vmul.f32 -1.442695, %v1422_v63 }
0x1156   :  { %v1517_v9 = vpop.f32.mrb[12].mxu1 }
0x1157   :  { %v1521_v2 = vadd.f32 %v1877_v12, %v1517_v9  ;;  %v2122_v0 = vpop.f32.mrb[13].mxu1 }
0x1159   :  { %2345 = vtanh.f32 %v1521_v2  ;;  %v1879_v6 = vmul.f32 -1.442695, %v1521_v2 }
0x115a   :  { %2347 = vpow2.f32 %v1876_v13 }
0x115b   :  { %2349 = vpow2.f32 %v1879_v6 }
0x115f   :  { %v2344_v3 = vpop.eup %2343 }
0x1160   :  { %1432 = vrot.lane.b32.xlu0 %v2344_v3, %s2379_s9 }
0x1163   :  { %v2346_v4 = vpop.eup %2345 }
0x1164   :  { %1531 = vrot.lane.b32.xlu1 %v2346_v4, %s2379_s9  ;;  %v2348_v7 = vpop.eup %2347 }
0x1165   :  { %v1426_v8 = vadd.f32 1.0, %v2348_v7  ;;  %v2350_v10 = vpop.eup %2349 }
0x1166   :  { %v1525_v11 = vadd.f32 1.0, %v2350_v10 }
0x1167   :  { %2351 = vrcp.f32 %v1426_v8 }
0x1168   :  { %2353 = vrcp.f32 %v1525_v11 }
0x1171   :  { %v2352_v14 = vpop.eup %2351 }
0x1172   :  { %v2354_v17 = vpop.eup %2353  ;;  %v1430_v20 = vmul.f32 %v2352_v14, %v1230_v50 }
0x1173   :  { %v1529_v23 = vmul.f32 %v2354_v17, %v1329_v53 }
0x11d2   :  { %v1433_v15 = vpop.permute.xlu0 %1432 }
0x11d3   :  { %v1435_v16 = vmul.f32 %v2352_v14, %v1433_v15 }
0x11d5   :  { %1437 = vrot.lane.b32.xlu0 %v1435_v16, %s2378_s2 }
0x11d6   :  { %v1532_v18 = vpop.permute.xlu1 %1531 }
0x11d7   :  { %v1534_v19 = vmul.f32 %v2354_v17, %v1532_v18 }
0x11d9   :  { %1536 = vrot.lane.b32.xlu1 %v1534_v19, %s2378_s2 }
0x1247   :  { %v1438_v21 = vpop.permute.xlu0 %1437 }
0x1248   :  { %v1440_v22 = vadd.f32 %v1438_v21, %v1430_v20 }
0x124a   :  { %2355 = vtanh.f32 %v1440_v22 }
0x124b   :  { %v1537_v24 = vpop.permute.xlu1 %1536 }
0x124c   :  { %v1539_v25 = vadd.f32 %v1537_v24, %v1529_v23 }
0x124e   :  { %2357 = vtanh.f32 %v1539_v25 }
0x1254   :  { %v2356_v26 = vpop.eup %2355 }
0x1255   :  { %1443 = vrot.lane.b32.xlu0 %v2356_v26, %s2379_s9 }
0x1258   :  { %v2358_v27 = vpop.eup %2357 }
0x1259   :  { %1542 = vrot.lane.b32.xlu1 %v2358_v27, %s2379_s9 }
0x12c7   :  { %v1444_v28 = vpop.permute.xlu0 %1443 }
0x12c8   :  { %v1446_v29 = vmul.f32 %v2352_v14, %v1444_v28 }
0x12ca   :  { %1547 = vrot.lane.b32.xlu0 %v1446_v29, %s2378_s2 }
0x12cb   :  { %v1543_v30 = vpop.permute.xlu1 %1542 }
0x12cc   :  { %v1545_v31 = vmul.f32 %v2354_v17, %v1543_v30 }
0x12ce   :  { %1553 = vrot.lane.b32.xlu1 %v1545_v31, %s2378_s2 }
0x133c   :  { %v1548_v32 = vpop.permute.xlu0 %1547 }
0x133d   :  { %1880 = vst.msk [vmem:[%s2783_s3 + $0x30] sm:$0xff] %vm59_vm0, %v1548_v32  ;;  %2132 = vmatmul.mubr.msk.f32.vlgmr.msra.gmra.mrb[14].mxu0 %vm59_vm0, %v1548_v32 }
0x1340   :  { %v1554_v33 = vpop.permute.xlu1 %1553 }
0x1341   :  { %1881 = vst.msk [vmem:[%s2784_s4 + $0x8] sm:$0xff] %vm59_vm0, %v1554_v33  ;;  %2143 = vmatmul.mubr.msk.f32.vlgmr.msra.gmra.mrb[14].mxu1 %vm59_vm0, %v1554_v33 }
0x1410   :  { %v1628_v35 = vpop.f32.mrb[14].mxu0 }
0x1411   :  { %v1632_v36 = vadd.f32 %v1882_v34, %v1628_v35  ;;  %v2133_v37 = vpop.f32.mrb[15].mxu0 }
0x1413   :  { %2359 = vtanh.f32 %v1632_v36  ;;  %v1884_v44 = vmul.f32 -1.442695, %v1632_v36 }
0x1414   :  { %v1726_v39 = vpop.f32.mrb[14].mxu1 }
0x1415   :  { %v1730_v40 = vadd.f32 %v1885_v38, %v1726_v39  ;;  %v2144_v41 = vpop.f32.mrb[15].mxu1 }
0x1417   :  { %2361 = vtanh.f32 %v1730_v40  ;;  %v1887_v45 = vmul.f32 -1.442695, %v1730_v40 }
0x1418   :  { %2363 = vpow2.f32 %v1884_v44 }
0x1419   :  { %2365 = vpow2.f32 %v1887_v45 }
0x141d   :  { %v2360_v42 = vpop.eup %2359 }
0x141e   :  { %1642 = vrot.lane.b32.xlu0 %v2360_v42, %s2379_s9 }
0x1421   :  { %v2362_v43 = vpop.eup %2361 }
0x1422   :  { %1740 = vrot.lane.b32.xlu1 %v2362_v43, %s2379_s9  ;;  %v2364_v46 = vpop.eup %2363 }
0x1423   :  { %v1636_v47 = vadd.f32 1.0, %v2364_v46  ;;  %v2366_v48 = vpop.eup %2365 }
0x1424   :  { %v1734_v49 = vadd.f32 1.0, %v2366_v48 }
0x1425   :  { %2367 = vrcp.f32 %v1636_v47 }
0x1426   :  { %2369 = vrcp.f32 %v1734_v49 }
0x142f   :  { %v2368_v50 = vpop.eup %2367 }
0x1430   :  { %v2370_v53 = vpop.eup %2369  ;;  %v1640_v56 = vmul.f32 %v2368_v50, %v1440_v22 }
0x1431   :  { %v1738_v59 = vmul.f32 %v2370_v53, %v1539_v25 }
0x1490   :  { %v1643_v51 = vpop.permute.xlu0 %1642 }
0x1491   :  { %v1645_v52 = vmul.f32 %v2368_v50, %v1643_v51 }
0x1493   :  { %1647 = vrot.lane.b32.xlu0 %v1645_v52, %s2378_s2 }
0x1494   :  { %v1741_v54 = vpop.permute.xlu1 %1740 }
0x1495   :  { %v1743_v55 = vmul.f32 %v2370_v53, %v1741_v54 }
0x1497   :  { %1745 = vrot.lane.b32.xlu1 %v1743_v55, %s2378_s2 }
0x1505   :  { %v1648_v57 = vpop.permute.xlu0 %1647 }
0x1506   :  { %v1650_v58 = vadd.f32 %v1648_v57, %v1640_v56 }
0x1508   :  { %2371 = vtanh.f32 %v1650_v58 }
0x1509   :  { %v1746_v60 = vpop.permute.xlu1 %1745 }
0x150a   :  { %v1748_v61 = vadd.f32 %v1746_v60, %v1738_v59 }
0x150c   :  { %2373 = vtanh.f32 %v1748_v61 }
0x1512   :  { %v2372_v5 = vpop.eup %2371 }
0x1513   :  { %1653 = vrot.lane.b32.xlu0 %v2372_v5, %s2379_s9 }
0x1516   :  { %v2374_v62 = vpop.eup %2373 }
0x1517   :  { %1751 = vrot.lane.b32.xlu1 %v2374_v62, %s2379_s9 }
0x1585   :  { %v1654_v63 = vpop.permute.xlu0 %1653 }
0x1586   :  { %v1656_v1 = vmul.f32 %v2368_v50, %v1654_v63 }
0x1588   :  { %1756 = vrot.lane.b32.xlu0 %v1656_v1, %s2378_s2 }
0x1589   :  { %v1752_v12 = vpop.permute.xlu1 %1751 }
0x158a   :  { %v1754_v9 = vmul.f32 %v2370_v53, %v1752_v12 }
0x158c   :  { %1762 = vrot.lane.b32.xlu1 %v1754_v9, %s2378_s2  ;;  %1768 = vrot.lane.b32.xlu0 %v1650_v58, %s2380_s0 }
0x1590   :  { %1774 = vrot.lane.b32.xlu1 %v1748_v61, %s2380_s0 }
0x15fa   :  { %v1757_v2 = vpop.permute.xlu0 %1756 }
0x15fb   :  { %1888 = vst.msk [vmem:[%s2783_s3 + $0x38] sm:$0xff] %vm59_vm0, %v1757_v2  ;;  %1766 = vst.msk [vmem:[#allocation2] sm:$0xff] %vm59_vm0, %v1757_v2 }
0x15fe   :  { %v1763_v0 = vpop.permute.xlu1 %1762  ;;  %v1769_v3 = vpop.permute.xlu0 %1768 }
0x15ff   :  { %1765 = vst.msk [vmem:[%s2784_s4] sm:$0xff] %vm59_vm0, %v1763_v0  ;;  %1772 = vst.msk [vmem:[#allocation2 + $0x8] sm:$0xff] %vm59_vm0, %v1763_v0 }
0x1600   :  { %1771 = vst.msk [vmem:[#allocation3] sm:$0xff] %vm59_vm0, %v1769_v3 }
0x1602   :  { %v1775_v4 = vpop.permute.xlu1 %1774 }
0x1603   :  { %1777 = vst.msk [vmem:[#allocation3 + $0x8] sm:$0xff] %vm59_vm0, %v1775_v4 }

</bundles_post_ra>
